<compile_context>
chip_gen: v7x
topology: tpu7x:2x2x1
jax: 0.10.0
libtpu: 0.0.40
codegen_flags: <defaults>
</compile_context>

<pallas_src>
import math
from functools import partial

import numpy as np
import jax
import jax.numpy as jnp
from jax.experimental import pallas as pl
from jax.experimental.pallas import tpu as pltpu

# ----------------------------- configuration -------------------------------
W_DIM = 32           # intermediate latent dim
C_IN = 4             # in_channels
C_OUT = 8            # out_channels
RES = 16             # resolution (up=1 -> input resolution == RES)
KSIZE = 3
PAD = KSIZE // 2     # 1
NTAPS = KSIZE * KSIZE
HW = RES * RES

LRELU_ALPHA = 0.2
ACT_GAIN = math.sqrt(2.0) * 1.0       # def_gain('lrelu') * gain(=1)
DEMOD_EPS = 1e-8
AFFINE_GAIN = 1.0 / math.sqrt(W_DIM)  # FullyConnectedLayer weight_gain (lr_mult=1)

# packed-constant row layout (single (PACK_ROWS, C_OUT) slab)
ROW_AW = 0                       # [0:32)  affine W^T * gain, zero-padded 4->8 lanes
ROW_AB = W_DIM                   # [32:33) affine bias, zero-padded 4->8 lanes
ROW_TAPS = W_DIM + 1             # [33:69) conv taps, row = (ky*3+kx)*C_IN + ci
ROW_WSQ = ROW_TAPS + NTAPS * C_IN  # [69:73) sum_{ky,kx} W^2, (C_IN, C_OUT)
PACK_ROWS = ROW_WSQ + C_IN       # 73


# ------------------------------- kernel ------------------------------------
def synthesis_kernel(w_ref, x_ref, pack_ref, nb_ref, out_ref, xpad_ref):
    bb = out_ref.shape[0]                                   # B_BLK (static)

    # ---- affine for the whole block: styles = w @ (A^T*gain) + b (pre-baked) ----
    wlat = w_ref[...].reshape(bb, W_DIM)                    # (bb, 32)
    aw = pack_ref[ROW_AW:ROW_AW + W_DIM, :]                 # (32, 8); cols >= C_IN are 0
    ab = pack_ref[ROW_AB:ROW_AB + 1, :]                     # (1, 8)
    styles = (jnp.dot(wlat, aw, preferred_element_type=jnp.float32)
              + ab)[:, :C_IN]                               # (bb, C_IN)

    # ---- demodulation coefficients from precomputed squared-weight sums ----
    wsq = pack_ref[ROW_WSQ:ROW_WSQ + C_IN, :]               # (C_IN, C_OUT)
    dcoefs = jax.lax.rsqrt(
        jnp.dot(styles * styles, wsq, preferred_element_type=jnp.float32)
        + DEMOD_EPS)                                        # (bb, C_OUT)

    # ---- modulate + zero-pad in-kernel: write interior of a zeroed VMEM scratch ----
    xpad_ref[...] = jnp.zeros_like(xpad_ref)
    xpad_ref[:, PAD:PAD + RES, PAD:PAD + RES, :] = (
        x_ref[...] * styles[:, None, None, :])              # (bb, 16, 16, 4)
    xm = xpad_ref[...]                                      # (bb, 18, 18, 4)

    # ---- im2col: one fused (bb*256, 36) @ (36, 8) f32 MXU matmul ----
    cols = [xm[:, ky:ky + RES, kx:kx + RES, :].reshape(bb * HW, C_IN)
            for ky in range(KSIZE) for kx in range(KSIZE)]
    win = jnp.concatenate(cols, axis=-1)                    # (bb*256, 36)
    wtaps = pack_ref[ROW_TAPS:ROW_TAPS + NTAPS * C_IN, :]   # (36, 8)
    acc = jnp.dot(win, wtaps, preferred_element_type=jnp.float32)   # (bb*256, 8)

    # ---- channel-major (lane-dense) output: demod, +noise+bias, lrelu * gain ----
    y = jnp.transpose(acc.reshape(bb, HW, C_OUT), (0, 2, 1))        # (bb, 8, 256)
    y = y * dcoefs[:, :, None] + nb_ref[...]                        # noise+bias pre-merged
    out_ref[...] = jnp.where(y >= 0.0, y, LRELU_ALPHA * y) * ACT_GAIN


# ------------------------------- wrapper ------------------------------------
@partial(jax.jit, static_argnames=("b_blk",))
def synthesis_forward(x_nchw, w_lat, baked, b_blk=None):
    B = x_nchw.shape[0]
    if b_blk is None:
        # <=2 blocks (both v7x TensorCores for small B); cap keeps VMEM comfortable
        # on every generation without touching vmem_limit_bytes.
        b_blk = max(1, min((B + 1) // 2, 128))
    grid = pl.cdiv(B, b_blk)
    Bp = grid * b_blk

    # Input-side layout plumbing only: tiny NCHW -> NHWC transpose (channels on lanes).
    # No wrapper-side pad and no output-side transpose (output is emitted NC(HW)).
    x = jnp.transpose(x_nchw, (0, 2, 3, 1))                 # (B, 16, 16, 4)
    w3 = w_lat.reshape(B, 1, W_DIM)
    if Bp != B:
        x = jnp.pad(x, ((0, Bp - B), (0, 0), (0, 0), (0, 0)))
        w3 = jnp.pad(w3, ((0, Bp - B), (0, 0), (0, 0)))

    out = pl.pallas_call(
        synthesis_kernel,
        out_shape=jax.ShapeDtypeStruct((Bp, C_OUT, HW), jnp.float32),
        grid=(grid,),
        in_specs=[
            pl.BlockSpec((b_blk, 1, W_DIM), lambda b: (b, 0, 0)),          # w latents
            pl.BlockSpec((b_blk, RES, RES, C_IN), lambda b: (b, 0, 0, 0)),  # x (NHWC, unpadded)
            pl.BlockSpec((PACK_ROWS, C_OUT), lambda b: (0, 0)),             # packed constants
            pl.BlockSpec((C_OUT, HW), lambda b: (0, 0)),                    # noise+bias (lane-dense)
        ],
        out_specs=pl.BlockSpec((b_blk, C_OUT, HW), lambda b: (b, 0, 0)),
        scratch_shapes=[pltpu.VMEM((b_blk, RES + 2 * PAD, RES + 2 * PAD, C_IN),
                                   jnp.float32)],
        compiler_params=pltpu.CompilerParams(dimension_semantics=("parallel",)),
    )(w3, x, baked["pack"], baked["noisebias"])

    return out[:B].reshape(B, C_OUT, RES, RES)              # free reshape, no transpose


# ------------------------- deterministic parameters --------------------------
def init_params(key):
    k0, k1, k2, k3 = jax.random.split(key, 4)
    # raw (torch-layout) params
    affine_w = jax.random.normal(k0, (C_IN, W_DIM), jnp.float32)   # randn([out,in])
    affine_b = jnp.ones((C_IN,), jnp.float32)                      # bias_init=1
    conv_w = jax.random.normal(k1, (C_OUT, C_IN, KSIZE, KSIZE), jnp.float32)
    conv_b = 0.1 * jax.random.normal(k2, (C_OUT,), jnp.float32)    # torch init=0; nonzero to exercise path
    noise_const = jax.random.normal(k3, (RES, RES), jnp.float32)
    noise_strength = jnp.float32(0.25)                             # torch init=0; nonzero to exercise path
    raw = dict(affine_w=affine_w, affine_b=affine_b, conv_w=conv_w, conv_b=conv_b,
               noise_const=noise_const, noise_strength=noise_strength)

    # pre-baked, kernel-ready params.  NOTE: valid for frozen params only; re-bake if training.
    aw8 = jnp.zeros((W_DIM, C_OUT), jnp.float32).at[:, :C_IN].set(
        (affine_w * AFFINE_GAIN).T)                                # (32, 8)
    ab8 = jnp.zeros((1, C_OUT), jnp.float32).at[0, :C_IN].set(affine_b)
    wtaps36 = jnp.transpose(conv_w, (2, 3, 1, 0)).reshape(NTAPS * C_IN, C_OUT)  # (36, 8)
    wsq = jnp.sum(conv_w * conv_w, axis=(2, 3)).T                  # (4, 8)
    pack = jnp.concatenate([aw8, ab8, wtaps36, wsq], axis=0)       # (73, 8) f32
    noisebias = (noise_const * noise_strength).reshape(1, HW) + conv_b[:, None]  # (8, 256)
    baked = dict(pack=pack, noisebias=noisebias)
    return raw, baked


# ------------------------- pure-JAX reference (check) ------------------------
def reference_forward(x, w_lat, p):
    B = x.shape[0]
    hi = jax.lax.Precision.HIGHEST
    styles = jnp.dot(w_lat, (p["affine_w"] * AFFINE_GAIN).T, precision=hi) \
        + p["affine_b"]                                            # (B, C_IN)
    # fused modulated conv (grouped per-sample conv), demodulate=True
    wmod = p["conv_w"][None] * styles[:, None, :, None, None]      # (B,Cout,Cin,3,3)
    dcoefs = jax.lax.rsqrt(jnp.sum(wmod * wmod, axis=(2, 3, 4)) + DEMOD_EPS)
    wmod = wmod * dcoefs[:, :, None, None, None]
    xg = x.reshape(1, B * C_IN, RES, RES)
    wg = wmod.reshape(B * C_OUT, C_IN, KSIZE, KSIZE)
    y = jax.lax.conv_general_dilated(
        xg, wg, window_strides=(1, 1), padding=((PAD, PAD), (PAD, PAD)),
        dimension_numbers=("NCHW", "OIHW", "NCHW"),
        feature_group_count=B, precision=hi)
    y = y.reshape(B, C_OUT, RES, RES)
    y = y + (p["noise_const"] * p["noise_strength"])[None, None]   # const noise
    y = y + p["conv_b"].reshape(1, -1, 1, 1)                       # bias_act bias
    y = jnp.where(y >= 0, y, LRELU_ALPHA * y) * ACT_GAIN           # lrelu * gain
    return y


# --------------------------------- main --------------------------------------
if __name__ == "__main__":
    key = jax.random.PRNGKey(0)
    kx, kw, kp = jax.random.split(key, 3)
    raw, baked = init_params(kp)

    # B=2 exercises b_blk=1 (2 parallel blocks); B=4 exercises batched blocks (b_blk=2).
    for B in (2, 4):
        x = jax.random.normal(jax.random.fold_in(kx, B), (B, C_IN, RES, RES), jnp.float32)
        w_lat = jax.random.normal(jax.random.fold_in(kw, B), (B, W_DIM), jnp.float32)

        out = jax.block_until_ready(synthesis_forward(x, w_lat, baked))
        ref = jax.block_until_ready(reference_forward(x, w_lat, raw))

        assert out.shape == (B, C_OUT, RES, RES), out.shape
        np.testing.assert_allclose(np.asarray(out), np.asarray(ref), rtol=2e-2, atol=2e-2)

    print("KERNEL_OK")
</pallas_src>

<mosaic_0001>
module attributes {stable_mosaic.version = 11 : i64} {
  func.func @synthesis_kernel(%arg0: i32, %arg1: memref<1x1x32xf32, #tpu.memory_space<vmem>>, %arg2: memref<1x16x16x4xf32, #tpu.memory_space<vmem>>, %arg3: memref<73x8xf32, #tpu.memory_space<vmem>>, %arg4: memref<8x256xf32, #tpu.memory_space<vmem>>, %arg5: memref<1x8x256xf32, #tpu.memory_space<vmem>>, %arg6: memref<1x18x18x4xf32, #tpu.memory_space<vmem>>) attributes {dimension_semantics = [#tpu.dimension_semantics<parallel>], iteration_bounds = array<i64: 2>, scalar_prefetch = 0 : i64, scratch_operands = 1 : i64, tpu.core_type = #tpu.core_type<tc>, window_params = [{transform_indices = @transform_0, window_bounds = array<i64: 1, 1, 32>}, {transform_indices = @transform_1, window_bounds = array<i64: 1, 16, 16, 4>}, {pipeline_mode = #tpu.pipeline_mode<synchronous>, transform_indices = @transform_2, window_bounds = array<i64: 73, 8>}, {pipeline_mode = #tpu.pipeline_mode<synchronous>, transform_indices = @transform_3, window_bounds = array<i64: 8, 256>}, {transform_indices = @transform_4, window_bounds = array<i64: 1, 8, 256>}]} {
    %c0 = arith.constant 0 : index
    %c0_0 = arith.constant 0 : index
    %c0_1 = arith.constant 0 : index
    %0 = vector.load %arg1[%c0, %c0_0, %c0_1] : memref<1x1x32xf32, #tpu.memory_space<vmem>>, vector<1x1x32xf32>
    %1 = vector.shape_cast %0 : vector<1x1x32xf32> to vector<1x32xf32>
    %c0_2 = arith.constant 0 : index
    %c0_3 = arith.constant 0 : index
    %2 = vector.load %arg3[%c0_2, %c0_3] : memref<73x8xf32, #tpu.memory_space<vmem>>, vector<32x8xf32>
    %c32 = arith.constant 32 : index
    %c0_4 = arith.constant 0 : index
    %3 = vector.load %arg3[%c32, %c0_4] : memref<73x8xf32, #tpu.memory_space<vmem>>, vector<1x8xf32>
    %cst = arith.constant dense<0.000000e+00> : vector<1x8xf32>
    %4 = tpu.matmul %1, %2, %cst {dimension_numbers = #tpu.dot_dimension_numbers<[1], [0], [0], [1], [0, 0, 1, 1], [], []>} : vector<1x32xf32>, vector<32x8xf32>, vector<1x8xf32> -> vector<1x8xf32>
    %5 = arith.addf %4, %3 : vector<1x8xf32>
    %6 = vector.extract_strided_slice %5 {offsets = [0, 0], sizes = [1, 4], strides = [1, 1]} : vector<1x8xf32> to vector<1x4xf32>
    %c69 = arith.constant 69 : index
    %c0_5 = arith.constant 0 : index
    %7 = vector.load %arg3[%c69, %c0_5] : memref<73x8xf32, #tpu.memory_space<vmem>>, vector<4x8xf32>
    %8 = arith.mulf %6, %6 : vector<1x4xf32>
    %cst_6 = arith.constant dense<0.000000e+00> : vector<1x8xf32>
    %9 = tpu.matmul %8, %7, %cst_6 {dimension_numbers = #tpu.dot_dimension_numbers<[1], [0], [0], [1], [0, 0, 1, 1], [], []>} : vector<1x4xf32>, vector<4x8xf32>, vector<1x8xf32> -> vector<1x8xf32>
    %cst_7 = arith.constant 9.99999993E-9 : f32
    %10 = vector.broadcast %cst_7 : f32 to vector<1x8xf32>
    %11 = arith.addf %9, %10 : vector<1x8xf32>
    %12 = math.rsqrt %11 : vector<1x8xf32>
    %cst_8 = arith.constant 0.000000e+00 : f32
    %13 = vector.broadcast %cst_8 : f32 to vector<1x18x18x4xf32>
    %c0_9 = arith.constant 0 : index
    %c0_10 = arith.constant 0 : index
    %c0_11 = arith.constant 0 : index
    %c0_12 = arith.constant 0 : index
    %14 = vector.load %arg6[%c0_9, %c0_10, %c0_11, %c0_12] : memref<1x18x18x4xf32, #tpu.memory_space<vmem>>, vector<1x18x18x4xf32>
    tpu.vector_store %arg6[%c0_9, %c0_10, %c0_11, %c0_12], %13 {strides = array<i32>} : memref<1x18x18x4xf32, #tpu.memory_space<vmem>>, vector<1x18x18x4xf32>,
    %c0_13 = arith.constant 0 : index
    %c0_14 = arith.constant 0 : index
    %c0_15 = arith.constant 0 : index
    %c0_16 = arith.constant 0 : index
    %15 = vector.load %arg2[%c0_13, %c0_14, %c0_15, %c0_16] : memref<1x16x16x4xf32, #tpu.memory_space<vmem>>, vector<1x16x16x4xf32>
    %16 = vector.shape_cast %6 : vector<1x4xf32> to vector<1x1x1x4xf32>
    %17 = vector.broadcast %16 : vector<1x1x1x4xf32> to vector<1x16x16x4xf32>
    %18 = arith.mulf %15, %17 : vector<1x16x16x4xf32>
    %c0_17 = arith.constant 0 : index
    %c1 = arith.constant 1 : index
    %c1_18 = arith.constant 1 : index
    %c0_19 = arith.constant 0 : index
    %19 = vector.load %arg6[%c0_17, %c1, %c1_18, %c0_19] : memref<1x18x18x4xf32, #tpu.memory_space<vmem>>, vector<1x16x16x4xf32>
    tpu.vector_store %arg6[%c0_17, %c1, %c1_18, %c0_19], %18 {strides = array<i32>} : memref<1x18x18x4xf32, #tpu.memory_space<vmem>>, vector<1x16x16x4xf32>,
    %c0_20 = arith.constant 0 : index
    %c0_21 = arith.constant 0 : index
    %c0_22 = arith.constant 0 : index
    %c0_23 = arith.constant 0 : index
    %20 = vector.load %arg6[%c0_20, %c0_21, %c0_22, %c0_23] : memref<1x18x18x4xf32, #tpu.memory_space<vmem>>, vector<1x18x18x4xf32>
    %21 = vector.extract_strided_slice %20 {offsets = [0, 0, 0, 0], sizes = [1, 16, 16, 4], strides = [1, 1, 1, 1]} : vector<1x18x18x4xf32> to vector<1x16x16x4xf32>
    %22 = vector.shape_cast %21 : vector<1x16x16x4xf32> to vector<256x4xf32>
    %23 = vector.extract_strided_slice %20 {offsets = [0, 0, 1, 0], sizes = [1, 16, 16, 4], strides = [1, 1, 1, 1]} : vector<1x18x18x4xf32> to vector<1x16x16x4xf32>
    %24 = vector.shape_cast %23 : vector<1x16x16x4xf32> to vector<256x4xf32>
    %25 = vector.extract_strided_slice %20 {offsets = [0, 0, 2, 0], sizes = [1, 16, 16, 4], strides = [1, 1, 1, 1]} : vector<1x18x18x4xf32> to vector<1x16x16x4xf32>
    %26 = vector.shape_cast %25 : vector<1x16x16x4xf32> to vector<256x4xf32>
    %27 = vector.extract_strided_slice %20 {offsets = [0, 1, 0, 0], sizes = [1, 16, 16, 4], strides = [1, 1, 1, 1]} : vector<1x18x18x4xf32> to vector<1x16x16x4xf32>
    %28 = vector.shape_cast %27 : vector<1x16x16x4xf32> to vector<256x4xf32>
    %29 = vector.extract_strided_slice %20 {offsets = [0, 1, 1, 0], sizes = [1, 16, 16, 4], strides = [1, 1, 1, 1]} : vector<1x18x18x4xf32> to vector<1x16x16x4xf32>
    %30 = vector.shape_cast %29 : vector<1x16x16x4xf32> to vector<256x4xf32>
    %31 = vector.extract_strided_slice %20 {offsets = [0, 1, 2, 0], sizes = [1, 16, 16, 4], strides = [1, 1, 1, 1]} : vector<1x18x18x4xf32> to vector<1x16x16x4xf32>
    %32 = vector.shape_cast %31 : vector<1x16x16x4xf32> to vector<256x4xf32>
    %33 = vector.extract_strided_slice %20 {offsets = [0, 2, 0, 0], sizes = [1, 16, 16, 4], strides = [1, 1, 1, 1]} : vector<1x18x18x4xf32> to vector<1x16x16x4xf32>
    %34 = vector.shape_cast %33 : vector<1x16x16x4xf32> to vector<256x4xf32>
    %35 = vector.extract_strided_slice %20 {offsets = [0, 2, 1, 0], sizes = [1, 16, 16, 4], strides = [1, 1, 1, 1]} : vector<1x18x18x4xf32> to vector<1x16x16x4xf32>
    %36 = vector.shape_cast %35 : vector<1x16x16x4xf32> to vector<256x4xf32>
    %37 = vector.extract_strided_slice %20 {offsets = [0, 2, 2, 0], sizes = [1, 16, 16, 4], strides = [1, 1, 1, 1]} : vector<1x18x18x4xf32> to vector<1x16x16x4xf32>
    %38 = vector.shape_cast %37 : vector<1x16x16x4xf32> to vector<256x4xf32>
    %39 = tpu.concatenate %22, %24, %26, %28, %30, %32, %34, %36, %38 in 1 : vector<256x4xf32>, vector<256x4xf32>, vector<256x4xf32>, vector<256x4xf32>, vector<256x4xf32>, vector<256x4xf32>, vector<256x4xf32>, vector<256x4xf32>, vector<256x4xf32> -> vector<256x36xf32>
    %c33 = arith.constant 33 : index
    %c0_24 = arith.constant 0 : index
    %40 = vector.load %arg3[%c33, %c0_24] : memref<73x8xf32, #tpu.memory_space<vmem>>, vector<36x8xf32>
    %cst_25 = arith.constant dense<0.000000e+00> : vector<256x8xf32>
    %41 = tpu.matmul %39, %40, %cst_25 {dimension_numbers = #tpu.dot_dimension_numbers<[1], [0], [0], [1], [0, 0, 1, 1], [], []>} : vector<256x36xf32>, vector<36x8xf32>, vector<256x8xf32> -> vector<256x8xf32>
    %42 = vector.shape_cast %41 : vector<256x8xf32> to vector<1x256x8xf32>
    %43 = tpu.transpose %42, [0, 2, 1] : vector<1x256x8xf32> -> vector<1x8x256xf32>
    %44 = vector.shape_cast %12 : vector<1x8xf32> to vector<1x8x1xf32>
    %45 = vector.broadcast %44 : vector<1x8x1xf32> to vector<1x8x256xf32>
    %46 = arith.mulf %43, %45 : vector<1x8x256xf32>
    %c0_26 = arith.constant 0 : index
    %c0_27 = arith.constant 0 : index
    %47 = vector.load %arg4[%c0_26, %c0_27] : memref<8x256xf32, #tpu.memory_space<vmem>>, vector<8x256xf32>
    %48 = vector.shape_cast %47 : vector<8x256xf32> to vector<1x8x256xf32>
    %49 = arith.addf %46, %48 : vector<1x8x256xf32>
    %cst_28 = arith.constant 0.000000e+00 : f32
    %50 = vector.broadcast %cst_28 : f32 to vector<1x8x256xf32>
    %51 = arith.cmpf oge, %49, %50 : vector<1x8x256xf32>
    %cst_29 = arith.constant 2.000000e-01 : f32
    %52 = vector.broadcast %cst_29 : f32 to vector<1x8x256xf32>
    %53 = arith.mulf %52, %49 : vector<1x8x256xf32>
    %54 = arith.select %51, %49, %53 : vector<1x8x256xi1>, vector<1x8x256xf32>
    %cst_30 = arith.constant 1.41421354 : f32
    %55 = vector.broadcast %cst_30 : f32 to vector<1x8x256xf32>
    %56 = arith.mulf %54, %55 : vector<1x8x256xf32>
    %c0_31 = arith.constant 0 : index
    %c0_32 = arith.constant 0 : index
    %c0_33 = arith.constant 0 : index
    %57 = vector.load %arg5[%c0_31, %c0_32, %c0_33] : memref<1x8x256xf32, #tpu.memory_space<vmem>>, vector<1x8x256xf32>
    tpu.vector_store %arg5[%c0_31, %c0_32, %c0_33], %56 {strides = array<i32>} : memref<1x8x256xf32, #tpu.memory_space<vmem>>, vector<1x8x256xf32>,
    return
  }
  func.func @transform_0(%arg0: i32) -> (i32, i32, i32) {
    %c0_i32 = arith.constant 0 : i32
    %c0_i32_0 = arith.constant 0 : i32
    %c0_i32_1 = arith.constant 0 : i32
    return %arg0, %c0_i32, %c0_i32_0 : i32, i32, i32
  }
  func.func @transform_1(%arg0: i32) -> (i32, i32, i32, i32) {
    %c0_i32 = arith.constant 0 : i32
    %c0_i32_0 = arith.constant 0 : i32
    %c0_i32_1 = arith.constant 0 : i32
    %c0_i32_2 = arith.constant 0 : i32
    return %arg0, %c0_i32, %c0_i32_0, %c0_i32_1 : i32, i32, i32, i32
  }
  func.func @transform_2(%arg0: i32) -> (i32, i32) {
    %c0_i32 = arith.constant 0 : i32
    %c0_i32_0 = arith.constant 0 : i32
    %c0_i32_1 = arith.constant 0 : i32
    return %c0_i32, %c0_i32_0 : i32, i32
  }
  func.func @transform_3(%arg0: i32) -> (i32, i32) {
    %c0_i32 = arith.constant 0 : i32
    %c0_i32_0 = arith.constant 0 : i32
    %c0_i32_1 = arith.constant 0 : i32
    return %c0_i32, %c0_i32_0 : i32, i32
  }
  func.func @transform_4(%arg0: i32) -> (i32, i32, i32) {
    %c0_i32 = arith.constant 0 : i32
    %c0_i32_0 = arith.constant 0 : i32
    %c0_i32_1 = arith.constant 0 : i32
    return %arg0, %c0_i32, %c0_i32_0 : i32, i32, i32
  }
}

</mosaic_0001>

<bundles_post_ra>
// kernel: synthesis_forward.1
= control target key start
LH: loop header
LB: loop body
LE: loop exit
PB: predicated region body
PF: predicated region fallthrough
CT: control target
= control target key end

     0   :  { %s2616_s15 = smov 0   ;;  %s4533_s0 = inlined_call_operand.vmem [shape: f32[2,1,32], index: 0, kind: input, shape index: {}]   ;;  %s4534_s1 = inlined_call_operand.vmem [shape: f32[2,16,16,4], index: 1, kind: input, shape index: {}]   ;;  %s4535_s2 = inlined_call_operand.vmem [shape: f32[73,8], index: 2, kind: input, shape index: {}]   ;;  %s4536_s3 = inlined_call_operand.vmem [shape: f32[8,256], index: 3, kind: input, shape index: {}]   ;;  %s4537_s4 = inlined_call_operand.vmem [shape: f32[2,8,256], index: 4, kind: output, shape index: {}]  }
   0x1 LB: > { %s2330_s16 = sadd.s32 4294967295, %s2578_s15   ;;  %p2334_p0 = scmp.ge.s32.totalorder %s2578_s15, 1  ;;  %s2578_s15 = sphi %s2616_s15, %s14_s15  }
   0x2   : > { %p170_p1 = scmp.lt.s32.totalorder %s2578_s15, 3 }
   0x4   : > { %p171_p2 = pnand %p2334_p0, %p170_p1 }
   0x6   : > { %174 = sbr.rel (%p171_p2) target bundleno = 1166 (0x48e), region = 36 }
   0xd   : > { %v213_v0 = vld [vmem:[%s4535_s2] sm:$0xff]  ;;  %v214_v1 = vld [vmem:[%s4535_s2 + $0x8] sm:$0xff]  ;;  %v215_v2 = vld [vmem:[%s4535_s2 + $0x10] sm:$0xff]  ;;  %v2580_v3 = vmov 0.0|0.0   ;;  %vm2581_vm0 = vmmov 0   ;;  %v2582_v6 = vmov 0.0   ;;  %v460_v23 = vlaneseq }
   0xe   : > { %2497 = vmatprep.subr.bf16.mxu0 %v2580_v3  ;;  %v2498_v4 = vpack.c.bf16 %v214_v1, %v213_v0  ;;  %v216_v5 = vld [vmem:[%s4535_s2 + $0x18] sm:$0xff]  ;;  %2431 = vmatprep.mubr.msk.f32.mxu0 %vm2581_vm0, %v2582_v6  ;;  %p199_p3 = scmp.lt.s32.totalorder %s2330_s16, 1  ;;  %vm218_vm1 = vcmask 261120   ;;  %vm294_vm2 = vcmask 31744   ;;  %vm375_vm3 = vcmask 25600   ;;  %s2583_s28 = smov 4  }
   0xf   : > { %2434 = vmatprep.subr.mxu1 %v2582_v6  ;;  %2436 = vmatprep.mubr.msk.f32.mxu1 %vm2581_vm0, %v2582_v6  ;;  %v2501_v7 = vpack.c.bf16 %v216_v5, %v215_v2  ;;  %373 = vst.msk [vmem:[#allocation2] sm:$0xff] %vm294_vm2, %v2582_v6  ;;  %374 = vst.msk [vmem:[#allocation2 + $0x8] sm:$0xff] %vm294_vm2, %v2582_v6  ;;  %vm631_vm4 = vcmask 1046528   ;;  %v292_v14 = vld [vmem:[%s4535_s2 + $0x45] sm:$0xf]  ;;  %vm298_vm5 = vcmask 1043456  }
  0x10   : > { %2499 = vmatpush3.bf16.msra.mxu0 %v2498_v4  ;;  %s4880_s16 = smov (!%p199_p3, %s2330_s16), 1  ;;  %377 = vst.msk [vmem:[#allocation2 + $0x18] sm:$0xff] %vm294_vm2, %v2582_v6  ;;  %378 = vst.msk [vmem:[#allocation2 + $0x20] sm:$0xff] %vm294_vm2, %v2582_v6  ;;  %2435 = vmatpush3.msk.msra.mxu1 %vm298_vm5, %v292_v14  ;;  %vm712_vm6 = vcmask 1045504   ;;  %s2584_s5 = smov 8   ;;  %v2767_v24 = vshrl.u32 %v460_v23, 7 }
  0x11   : > { %2500 = vmatprep.subr.bf16.mxu0 %v2580_v3  ;;  %s201_s27 = scalar_lea.vmem %s4533_s0, %s4880_s16  ;;  %380 = vst.msk [vmem:[#allocation2 + $0x30] sm:$0xff] %vm294_vm2, %v2582_v6  ;;  %381 = vst.msk [vmem:[#allocation2 + $0x38] sm:$0xff] %vm294_vm2, %v2582_v6  ;;  %s2377_s6 = sshll.u32 %s4880_s16, 8  ;;  %v217_v25 = vld [vmem:[%s4535_s2 + $0x20] sm:$0x1]  ;;  %vm1619_vm7 = vcmask 64512  }
  0x12   : > { %v212_v8 = vld [vmem:[%s201_s27] sm:$0x1]  ;;  %383 = vst.msk [vmem:[#allocation2 + $0x48] sm:$0xff] %vm294_vm2, %v2582_v6  ;;  %384 = vst.msk [vmem:[#allocation2 + $0x50] sm:$0xff] %vm294_vm2, %v2582_v6  ;;  %s2772_s9 = scalar_lea.vmem %s4534_s1, %s2377_s6  ;;  %v4538_v26 = vsub.s32 0, %v2767_v24  ;;  %s2585_s12 = smov 12  }
  0x13   : > { %386 = vst.msk [vmem:[#allocation2 + $0x60] sm:$0xff] %vm294_vm2, %v2582_v6  ;;  %387 = vst.msk [vmem:[#allocation2 + $0x68] sm:$0xff] %vm294_vm2, %v2582_v6  ;;  %v428_v28 = vld [vmem:[%s2772_s9] sm:$0xff]  ;;  %v429_v29 = vld [vmem:[%s2772_s9 + $0x8] sm:$0xff]  ;;  %s2586_s13 = smov 16   ;;  %s2587_s14 = smov 20  }
  0x14   : > { %2502 = vmatpush3.bf16.msra.mxu0 %v2501_v7  ;;  %389 = vst.msk [vmem:[#allocation2 + $0x78] sm:$0xff] %vm294_vm2, %v2582_v6  ;;  %390 = vst.msk [vmem:[#allocation2 + $0x80] sm:$0xff] %vm294_vm2, %v2582_v6  ;;  %v430_v30 = vld [vmem:[%s2772_s9 + $0x10] sm:$0xff]  ;;  %v431_v31 = vld [vmem:[%s2772_s9 + $0x18] sm:$0xff]  ;;  %s2588_s21 = smov 24   ;;  %s2589_s26 = smov 28  }
  0x15   : > { %392 = vst.msk [vmem:[#allocation2 + $0x90] sm:$0xff] %vm294_vm2, %v2582_v6  ;;  %393 = vst.msk [vmem:[#allocation2 + $0x98] sm:$0xff] %vm294_vm2, %v2582_v6  ;;  %v432_v34 = vld [vmem:[%s2772_s9 + $0x20] sm:$0xff]  ;;  %v433_v35 = vld [vmem:[%s2772_s9 + $0x28] sm:$0xff]  ;;  %s2590_s29 = smov 32   ;;  %vm1652_vm8 = vcmask 97280  }
  0x16   : > { %395 = vst.msk [vmem:[#allocation2 + $0xa8] sm:$0xff] %vm294_vm2, %v2582_v6  ;;  %396 = vst.msk [vmem:[#allocation2 + $0xb0] sm:$0xff] %vm294_vm2, %v2582_v6  ;;  %v529_v9 = vld [vmem:[#allocation2] sm:$0xff]  ;;  %v530_v10 = vld [vmem:[#allocation2 + $0x8] sm:$0xff]  ;;  %vm1718_vm9 = vcmask 162816   ;;  %vm1685_vm10 = vcmask 130048  }
  0x17   : > { %2432 = vmatmul.mubr.msk.f32.vlgmr.msra.gmra.mrb[0].mxu0 %vm218_vm1, %v212_v8  ;;  %398 = vst.msk [vmem:[#allocation2 + $0xc0] sm:$0xff] %vm294_vm2, %v2582_v6  ;;  %399 = vst.msk [vmem:[#allocation2 + $0xc8] sm:$0xff] %vm294_vm2, %v2582_v6  ;;  %v632_v11 = vrot.slane %v529_v9, 1  ;;  %v633_v12 = vrot.slane %v530_v10, 1  ;;  %v714_v17 = vrot.slane %v530_v10, 2  ;;  %v713_v19 = vrot.slane %v529_v9, 2 }
  0x18   : > { %401 = vst.msk [vmem:[#allocation2 + $0xd8] sm:$0xff] %vm294_vm2, %v2582_v6  ;;  %402 = vst.msk [vmem:[#allocation2 + $0xe0] sm:$0xff] %vm294_vm2, %v2582_v6  ;;  %v434_v36 = vld [vmem:[%s2772_s9 + $0x30] sm:$0xff]  ;;  %v435_v37 = vld [vmem:[%s2772_s9 + $0x38] sm:$0xff]  ;;  %vm1751_vm11 = vcmask 195584   ;;  %vm1784_vm12 = vcmask 228352  }
  0x19   : > { %404 = vst.msk [vmem:[#allocation2 + $0xf0] sm:$0xff] %vm294_vm2, %v2582_v6  ;;  %405 = vst.msk [vmem:[#allocation2 + $0xf8] sm:$0xff] %vm294_vm2, %v2582_v6  ;;  %v634_v13 = vsel %vm631_vm4, %v632_v11, %v633_v12  ;;  %v715_v22 = vsel %vm712_vm6, %v713_v19, %v714_v17  ;;  %v436_v38 = vld [vmem:[%s2772_s9 + $0x40] sm:$0xff]  ;;  %v437_v39 = vld [vmem:[%s2772_s9 + $0x48] sm:$0xff]  ;;  %vm1854_vm13 = vcmask 293888   ;;  %s2378_s6 = sshll.u32 %s4880_s16, 4 }
  0x1a   : > { %407 = vst.msk [vmem:[#allocation2 + $0x108] sm:$0xff] %vm294_vm2, %v2582_v6  ;;  %408 = vst.msk [vmem:[#allocation2 + $0x110] sm:$0xff] %vm294_vm2, %v2582_v6  ;;  %819 = vrot.lane.b32.xlu0 %v634_v13, %s2583_s28  ;;  %v438_v40 = vld [vmem:[%s2772_s9 + $0x50] sm:$0xff]  ;;  %v439_v43 = vld [vmem:[%s2772_s9 + $0x58] sm:$0xff] }
  0x1b   : > { %410 = vst.msk [vmem:[#allocation2 + $0x120] sm:$0xff] %vm294_vm2, %v2582_v6  ;;  %411 = vst.msk [vmem:[#allocation2 + $0x128] sm:$0xff] %vm294_vm2, %v2582_v6  ;;  %v440_v44 = vld [vmem:[%s2772_s9 + $0x60] sm:$0xff]  ;;  %v441_v45 = vld [vmem:[%s2772_s9 + $0x68] sm:$0xff] }
  0x1c   : > { %413 = vst.msk [vmem:[#allocation2 + $0x138] sm:$0xff] %vm294_vm2, %v2582_v6  ;;  %414 = vst.msk [vmem:[#allocation2 + $0x140] sm:$0xff] %vm294_vm2, %v2582_v6  ;;  %v442_v46 = vld [vmem:[%s2772_s9 + $0x70] sm:$0xff]  ;;  %v443_v47 = vld [vmem:[%s2772_s9 + $0x78] sm:$0xff] }
  0x1d   : > { %416 = vst.msk [vmem:[#allocation2 + $0x150] sm:$0xff] %vm294_vm2, %v2582_v6  ;;  %417 = vst.msk [vmem:[#allocation2 + $0x158] sm:$0xff] %vm294_vm2, %v2582_v6  ;;  %v444_v48 = vld [vmem:[%s2772_s9 + $0x80] sm:$0xff]  ;;  %v445_v53 = vld [vmem:[%s2772_s9 + $0x88] sm:$0xff] }
  0x1e   : > { %419 = vst.msk [vmem:[#allocation2 + $0x168] sm:$0xff] %vm294_vm2, %v2582_v6  ;;  %420 = vst.msk [vmem:[#allocation2 + $0x170] sm:$0xff] %vm294_vm2, %v2582_v6  ;;  %v446_v54 = vld [vmem:[%s2772_s9 + $0x90] sm:$0xff]  ;;  %v447_v55 = vld [vmem:[%s2772_s9 + $0x98] sm:$0xff] }
  0x1f   : > { %422 = vst.msk [vmem:[#allocation2 + $0x180] sm:$0xff] %vm294_vm2, %v2582_v6  ;;  %423 = vst.msk [vmem:[#allocation2 + $0x188] sm:$0xff] %vm294_vm2, %v2582_v6  ;;  %v448_v60 = vld [vmem:[%s2772_s9 + $0xa0] sm:$0xff]  ;;  %v449_v61 = vld [vmem:[%s2772_s9 + $0xa8] sm:$0xff] }
  0x20   : > { %425 = vst.msk [vmem:[#allocation2 + $0x198] sm:$0xff] %vm294_vm2, %v2582_v6  ;;  %426 = vst.msk [vmem:[#allocation2 + $0x1a0] sm:$0xff] %vm294_vm2, %v2582_v6  ;;  %v450_v62 = vld [vmem:[%s2772_s9 + $0xb0] sm:$0xff]  ;;  %v451_v3 = vld [vmem:[%s2772_s9 + $0xb8] sm:$0xff] }
  0x21   : > { %376 = vst.msk [vmem:[#allocation2 + $0x10] sm:$0x3] %vm375_vm3, %v2582_v6  ;;  %379 = vst.msk [vmem:[#allocation2 + $0x28] sm:$0x3] %vm375_vm3, %v2582_v6  ;;  %v452_v4 = vld [vmem:[%s2772_s9 + $0xc0] sm:$0xff]  ;;  %v453_v5 = vld [vmem:[%s2772_s9 + $0xc8] sm:$0xff] }
  0x22   : > { %382 = vst.msk [vmem:[#allocation2 + $0x40] sm:$0x3] %vm375_vm3, %v2582_v6  ;;  %385 = vst.msk [vmem:[#allocation2 + $0x58] sm:$0x3] %vm375_vm3, %v2582_v6  ;;  %v454_v10 = vld [vmem:[%s2772_s9 + $0xd0] sm:$0xff]  ;;  %v455_v11 = vld [vmem:[%s2772_s9 + $0xd8] sm:$0xff] }
  0x23   : > { %388 = vst.msk [vmem:[#allocation2 + $0x70] sm:$0x3] %vm375_vm3, %v2582_v6  ;;  %391 = vst.msk [vmem:[#allocation2 + $0x88] sm:$0x3] %vm375_vm3, %v2582_v6  ;;  %v459_v19 = vld [vmem:[%s2772_s9 + $0xf8] sm:$0xff] }
  0x24   : > { %394 = vst.msk [vmem:[#allocation2 + $0xa0] sm:$0x3] %vm375_vm3, %v2582_v6  ;;  %397 = vst.msk [vmem:[#allocation2 + $0xb8] sm:$0x3] %vm375_vm3, %v2582_v6 }
  0x25   : > { %400 = vst.msk [vmem:[#allocation2 + $0xd0] sm:$0x3] %vm375_vm3, %v2582_v6  ;;  %403 = vst.msk [vmem:[#allocation2 + $0xe8] sm:$0x3] %vm375_vm3, %v2582_v6 }
  0x26   : > { %406 = vst.msk [vmem:[#allocation2 + $0x100] sm:$0x3] %vm375_vm3, %v2582_v6  ;;  %409 = vst.msk [vmem:[#allocation2 + $0x118] sm:$0x3] %vm375_vm3, %v2582_v6 }
  0x27   : > { %412 = vst.msk [vmem:[#allocation2 + $0x130] sm:$0x3] %vm375_vm3, %v2582_v6  ;;  %415 = vst.msk [vmem:[#allocation2 + $0x148] sm:$0x3] %vm375_vm3, %v2582_v6 }
  0x28   : > { %418 = vst.msk [vmem:[#allocation2 + $0x160] sm:$0x3] %vm375_vm3, %v2582_v6  ;;  %421 = vst.msk [vmem:[#allocation2 + $0x178] sm:$0x3] %vm375_vm3, %v2582_v6  ;;  %v531_v15 = vld [vmem:[#allocation2 + $0x10] sm:$0x3] }
  0x29   : > { %424 = vst.msk [vmem:[#allocation2 + $0x190] sm:$0x3] %vm375_vm3, %v2582_v6  ;;  %427 = vst.msk [vmem:[#allocation2 + $0x1a8] sm:$0x3] %vm375_vm3, %v2582_v6  ;;  %v635_v16 = vrot.slane %v531_v15, 1  ;;  %v716_v18 = vrot.slane %v531_v15, 2 }
  0x2a   : > { %4612 = vst [vmem:[#allocation3_spill] sm:$0xff] %v2767_v24 }
  0x2b   : > { %v636_v20 = vsel %vm631_vm4, %v633_v12, %v635_v16  ;;  %v717_v21 = vsel %vm712_vm6, %v714_v17, %v716_v18  ;;  %v456_v12 = vld [vmem:[%s2772_s9 + $0xe0] sm:$0xff]  ;;  %v457_v17 = vld [vmem:[%s2772_s9 + $0xe8] sm:$0xff]  ;;  %v458_v18 = vld [vmem:[%s2772_s9 + $0xf0] sm:$0xff]  ;;  %s211_s9 = scalar_lea.vmem %s4537_s4, %s2378_s6 }
  0x2c   : > { %821 = vrot.lane.b32.xlu0 %v636_v20, %s2583_s28  ;;  %917 = vrot.lane.b32.xlu1 %v717_v21, %s2584_s5 }
  0x30   : > { %915 = vrot.lane.b32.xlu0 %v715_v22, %s2584_s5 }
  0xea   : > { %v288_v27 = vpop.f32.mrb[0].mxu0 }
  0xeb   : > { %v289_v32 = vadd.f32 %v288_v27, %v217_v25  ;;  %v2433_v33 = vpop.f32.mrb[1].mxu0 }
  0xed   : > { %v293_v41 = vmul.f32 %v289_v32, %v289_v32  ;;  %v2791_v42 = vrot.slane %v289_v32, %v4538_v26 }
  0xef   : > { %2437 = vmatmul.mubr.msk.f32.vlgmr.msra.gmra.mrb[0].mxu1 %vm294_vm2, %v293_v41  ;;  %v464_v49 = vmul.f32 %v2791_v42, %v428_v28  ;;  %v465_v50 = vmul.f32 %v2791_v42, %v429_v29  ;;  %v466_v51 = vmul.f32 %v2791_v42, %v430_v30  ;;  %v467_v52 = vmul.f32 %v2791_v42, %v431_v31 }
  0xf0   : > { %v468_v56 = vmul.f32 %v2791_v42, %v432_v34  ;;  %v469_v57 = vmul.f32 %v2791_v42, %v433_v35  ;;  %v470_v58 = vmul.f32 %v2791_v42, %v434_v36  ;;  %v471_v59 = vmul.f32 %v2791_v42, %v435_v37 }
  0xf1   : > { %497 = vst.msk [vmem:[#allocation2 + $0x19] sm:$0xff] %vm294_vm2, %v464_v49  ;;  %498 = vst.msk [vmem:[#allocation2 + $0x21] sm:$0xff] %vm294_vm2, %v465_v50  ;;  %v472_v63 = vmul.f32 %v2791_v42, %v436_v38  ;;  %v473_v0 = vmul.f32 %v2791_v42, %v437_v39  ;;  %v474_v1 = vmul.f32 %v2791_v42, %v438_v40 }
  0xf2   : > { %499 = vst.msk [vmem:[#allocation2 + $0x31] sm:$0xff] %vm294_vm2, %v466_v51  ;;  %500 = vst.msk [vmem:[#allocation2 + $0x39] sm:$0xff] %vm294_vm2, %v467_v52  ;;  %v475_v2 = vmul.f32 %v2791_v42, %v439_v43  ;;  %v476_v6 = vmul.f32 %v2791_v42, %v440_v44  ;;  %v477_v7 = vmul.f32 %v2791_v42, %v441_v45 }
  0xf3   : > { %501 = vst.msk [vmem:[#allocation2 + $0x49] sm:$0xff] %vm294_vm2, %v468_v56  ;;  %502 = vst.msk [vmem:[#allocation2 + $0x51] sm:$0xff] %vm294_vm2, %v469_v57  ;;  %v478_v8 = vmul.f32 %v2791_v42, %v442_v46  ;;  %v479_v9 = vmul.f32 %v2791_v42, %v443_v47  ;;  %v480_v13 = vmul.f32 %v2791_v42, %v444_v48 }
  0xf4   : > { %503 = vst.msk [vmem:[#allocation2 + $0x61] sm:$0xff] %vm294_vm2, %v470_v58  ;;  %504 = vst.msk [vmem:[#allocation2 + $0x69] sm:$0xff] %vm294_vm2, %v471_v59  ;;  %v481_v14 = vmul.f32 %v2791_v42, %v445_v53  ;;  %v482_v15 = vmul.f32 %v2791_v42, %v446_v54  ;;  %v483_v16 = vmul.f32 %v2791_v42, %v447_v55 }
  0xf5   : > { %505 = vst.msk [vmem:[#allocation2 + $0x79] sm:$0xff] %vm294_vm2, %v472_v63  ;;  %506 = vst.msk [vmem:[#allocation2 + $0x81] sm:$0xff] %vm294_vm2, %v473_v0  ;;  %v484_v20 = vmul.f32 %v2791_v42, %v448_v60  ;;  %v485_v21 = vmul.f32 %v2791_v42, %v449_v61  ;;  %v486_v22 = vmul.f32 %v2791_v42, %v450_v62 }
  0xf6   : > { %507 = vst.msk [vmem:[#allocation2 + $0x91] sm:$0xff] %vm294_vm2, %v474_v1  ;;  %508 = vst.msk [vmem:[#allocation2 + $0x99] sm:$0xff] %vm294_vm2, %v475_v2  ;;  %v487_v23 = vmul.f32 %v2791_v42, %v451_v3  ;;  %v488_v25 = vmul.f32 %v2791_v42, %v452_v4  ;;  %v489_v27 = vmul.f32 %v2791_v42, %v453_v5 }
  0xf7   : > { %509 = vst.msk [vmem:[#allocation2 + $0xa9] sm:$0xff] %vm294_vm2, %v476_v6  ;;  %510 = vst.msk [vmem:[#allocation2 + $0xb1] sm:$0xff] %vm294_vm2, %v477_v7  ;;  %v490_v28 = vmul.f32 %v2791_v42, %v454_v10  ;;  %v491_v29 = vmul.f32 %v2791_v42, %v455_v11  ;;  %v492_v30 = vmul.f32 %v2791_v42, %v456_v12 }
  0xf8   : > { %511 = vst.msk [vmem:[#allocation2 + $0xc1] sm:$0xff] %vm294_vm2, %v478_v8  ;;  %512 = vst.msk [vmem:[#allocation2 + $0xc9] sm:$0xff] %vm294_vm2, %v479_v9  ;;  %v493_v31 = vmul.f32 %v2791_v42, %v457_v17  ;;  %v494_v32 = vmul.f32 %v2791_v42, %v458_v18  ;;  %v495_v33 = vmul.f32 %v2791_v42, %v459_v19  ;;  %v2875_v34 = vld [vmem:[#allocation2 + $0x20] sm:$0xff]  ;;  %v2877_v35 = vld [vmem:[#allocation2 + $0x18] sm:$0xff] }
  0xf9   : > { %513 = vst.msk [vmem:[#allocation2 + $0xd9] sm:$0xff] %vm294_vm2, %v480_v13  ;;  %514 = vst.msk [vmem:[#allocation2 + $0xe1] sm:$0xff] %vm294_vm2, %v481_v14  ;;  %1013 = vrot.lane.b32.xlu1 %v2875_v34, %s2585_s12  ;;  %1011 = vrot.lane.b32.xlu0 %v2877_v35, %s2585_s12  ;;  %v2887_v36 = vld [vmem:[#allocation2 + $0x38] sm:$0xff]  ;;  %v2889_v37 = vld [vmem:[#allocation2 + $0x30] sm:$0xff]  ;;  %v637_v4 = vrot.slane %v2877_v35, 1  ;;  %v638_v5 = vrot.slane %v2875_v34, 1 }
  0xfa   : > { %515 = vst.msk [vmem:[#allocation2 + $0xf1] sm:$0xff] %vm294_vm2, %v482_v15  ;;  %516 = vst.msk [vmem:[#allocation2 + $0xf9] sm:$0xff] %vm294_vm2, %v483_v16  ;;  %v2895_v38 = vld [vmem:[#allocation2 + $0x50] sm:$0xff]  ;;  %v2897_v39 = vld [vmem:[#allocation2 + $0x48] sm:$0xff]  ;;  %v642_v2 = vrot.slane %v2889_v37, 1  ;;  %v643_v3 = vrot.slane %v2887_v36, 1 }
  0xfb   : > { %517 = vst.msk [vmem:[#allocation2 + $0x109] sm:$0xff] %vm294_vm2, %v484_v20  ;;  %518 = vst.msk [vmem:[#allocation2 + $0x111] sm:$0xff] %vm294_vm2, %v485_v21  ;;  %v2903_v40 = vld [vmem:[#allocation2 + $0x68] sm:$0xff]  ;;  %v2905_v41 = vld [vmem:[#allocation2 + $0x60] sm:$0xff]  ;;  %v647_v7 = vrot.slane %v2897_v39, 1  ;;  %v3018_v9 = vsel %vm631_vm4, %v637_v4, %v638_v5  ;;  %v648_v10 = vrot.slane %v2895_v38, 1 }
  0xfc   : > { %519 = vst.msk [vmem:[#allocation2 + $0x121] sm:$0xff] %vm294_vm2, %v486_v22  ;;  %520 = vst.msk [vmem:[#allocation2 + $0x129] sm:$0xff] %vm294_vm2, %v487_v23  ;;  %v2911_v42 = vld [vmem:[#allocation2 + $0x80] sm:$0xff]  ;;  %v2913_v43 = vld [vmem:[#allocation2 + $0x78] sm:$0xff]  ;;  %v3015_v8 = vsel %vm631_vm4, %v642_v2, %v643_v3  ;;  %v652_v13 = vrot.slane %v2905_v41, 1  ;;  %v653_v16 = vrot.slane %v2903_v40, 1 }
  0xfd   : > { %521 = vst.msk [vmem:[#allocation2 + $0x139] sm:$0xff] %vm294_vm2, %v488_v25  ;;  %522 = vst.msk [vmem:[#allocation2 + $0x141] sm:$0xff] %vm294_vm2, %v489_v27  ;;  %1017 = vrot.lane.b32.xlu1 %v2887_v36, %s2585_s12  ;;  %1015 = vrot.lane.b32.xlu0 %v2889_v37, %s2585_s12  ;;  %v2919_v44 = vld [vmem:[#allocation2 + $0x98] sm:$0xff]  ;;  %v2921_v45 = vld [vmem:[#allocation2 + $0x90] sm:$0xff]  ;;  %v3030_v14 = vsel %vm631_vm4, %v647_v7, %v648_v10  ;;  %v658_v19 = vrot.slane %v2911_v42, 1  ;;  %v657_v22 = vrot.slane %v2913_v43, 1 }
  0xfe   : > { %523 = vst.msk [vmem:[#allocation2 + $0x151] sm:$0xff] %vm294_vm2, %v490_v28  ;;  %524 = vst.msk [vmem:[#allocation2 + $0x159] sm:$0xff] %vm294_vm2, %v491_v29  ;;  %v2927_v46 = vld [vmem:[#allocation2 + $0xb0] sm:$0xff]  ;;  %v2929_v47 = vld [vmem:[#allocation2 + $0xa8] sm:$0xff]  ;;  %v3045_v20 = vsel %vm631_vm4, %v652_v13, %v653_v16  ;;  %v662_v27 = vrot.slane %v2921_v45, 1 }
  0xff   : > { %525 = vst.msk [vmem:[#allocation2 + $0x169] sm:$0xff] %vm294_vm2, %v492_v30  ;;  %526 = vst.msk [vmem:[#allocation2 + $0x171] sm:$0xff] %vm294_vm2, %v493_v31  ;;  %v2935_v48 = vld [vmem:[#allocation2 + $0xc8] sm:$0xff]  ;;  %v2937_v49 = vld [vmem:[#allocation2 + $0xc0] sm:$0xff]  ;;  %v3060_v28 = vsel %vm631_vm4, %v657_v22, %v658_v19  ;;  %v663_v30 = vrot.slane %v2919_v44, 1  ;;  %v668_v4 = vrot.slane %v2927_v46, 1 }
 0x100   : > { %527 = vst.msk [vmem:[#allocation2 + $0x181] sm:$0xff] %vm294_vm2, %v494_v32  ;;  %528 = vst.msk [vmem:[#allocation2 + $0x189] sm:$0xff] %vm294_vm2, %v495_v33  ;;  %v2943_v50 = vld [vmem:[#allocation2 + $0xe0] sm:$0xff]  ;;  %v2945_v51 = vld [vmem:[#allocation2 + $0xd8] sm:$0xff]  ;;  %v667_v33 = vrot.slane %v2929_v47, 1 }
 0x101   : > { %4613 = vst [vmem:[#allocation4_spill] sm:$0xff] %v2887_v36  ;;  %4614 = vst [vmem:[#allocation5_spill] sm:$0xff] %v2889_v37  ;;  %1021 = vrot.lane.b32.xlu1 %v2895_v38, %s2585_s12  ;;  %1019 = vrot.lane.b32.xlu0 %v2897_v39, %s2585_s12  ;;  %v2951_v52 = vld [vmem:[#allocation2 + $0xf8] sm:$0xff]  ;;  %v2953_v53 = vld [vmem:[#allocation2 + $0xf0] sm:$0xff]  ;;  %v3075_v2 = vsel %vm631_vm4, %v662_v27, %v663_v30 }
 0x102   : > { %4615 = vst [vmem:[#allocation6_spill] sm:$0xff] %v2897_v39  ;;  %4616 = vst [vmem:[#allocation7_spill] sm:$0xff] %v2905_v41  ;;  %v2959_v54 = vld [vmem:[#allocation2 + $0x110] sm:$0xff]  ;;  %v2961_v55 = vld [vmem:[#allocation2 + $0x108] sm:$0xff]  ;;  %v682_v26 = vrot.slane %v2953_v53, 1 }
 0x103   : > { %v2967_v56 = vld [vmem:[#allocation2 + $0x128] sm:$0xff]  ;;  %v2969_v57 = vld [vmem:[#allocation2 + $0x120] sm:$0xff]  ;;  %v3041_v18 = vld [vmem:[#allocation2 + $0x58] sm:$0x3]  ;;  %4620 = vst [vmem:[#allocation11_spill] sm:$0xff] %v3075_v2 }
 0x104   : > { %v2975_v58 = vld [vmem:[#allocation2 + $0x140] sm:$0xff]  ;;  %v2977_v59 = vld [vmem:[#allocation2 + $0x138] sm:$0xff]  ;;  %v3011_v6 = vld [vmem:[#allocation2 + $0x28] sm:$0x3]  ;;  %v650_v23 = vrot.slane %v3041_v18, 1 }
 0x105   : > { %1025 = vrot.lane.b32.xlu1 %v2903_v40, %s2585_s12  ;;  %1023 = vrot.lane.b32.xlu0 %v2905_v41, %s2585_s12  ;;  %v2983_v60 = vld [vmem:[#allocation2 + $0x158] sm:$0xff]  ;;  %v2985_v61 = vld [vmem:[#allocation2 + $0x150] sm:$0xff]  ;;  %v640_v11 = vrot.slane %v3011_v6, 1  ;;  %v3026_v12 = vld [vmem:[#allocation2 + $0x40] sm:$0x3] }
 0x106   : > { %v2991_v62 = vld [vmem:[#allocation2 + $0x170] sm:$0xff]  ;;  %v2993_v63 = vld [vmem:[#allocation2 + $0x168] sm:$0xff]  ;;  %v645_v17 = vrot.slane %v3026_v12, 1  ;;  %v3063_v29 = vsel %vm631_vm4, %v648_v10, %v650_v23  ;;  %v3086_v7 = vld [vmem:[#allocation2 + $0xa0] sm:$0x3]  ;;  %v672_v10 = vrot.slane %v2937_v49, 1 }
 0x107   : > { %v2999_v0 = vld [vmem:[#allocation2 + $0x188] sm:$0xff]  ;;  %v3001_v1 = vld [vmem:[#allocation2 + $0x180] sm:$0xff]  ;;  %v3033_v15 = vsel %vm631_vm4, %v638_v5, %v640_v11  ;;  %v3056_v25 = vld [vmem:[#allocation2 + $0x70] sm:$0x3]  ;;  %4619 = vst [vmem:[#allocation10_spill] sm:$0xff] %v3063_v29  ;;  %v3090_v11 = vsel %vm631_vm4, %v667_v33, %v668_v4  ;;  %v677_v23 = vrot.slane %v2945_v51, 1 }
 0x108   : > { %4617 = vst [vmem:[#allocation8_spill] sm:$0xff] %v2999_v0  ;;  %4618 = vst [vmem:[#allocation9_spill] sm:$0xff] %v3001_v1  ;;  %v3048_v21 = vsel %vm631_vm4, %v643_v3, %v645_v17  ;;  %v655_v31 = vrot.slane %v3056_v25, 1  ;;  %v3071_v32 = vld [vmem:[#allocation2 + $0x88] sm:$0x3]  ;;  %v665_v17 = vrot.slane %v3086_v7, 1 }
 0x109   : > { %1029 = vrot.lane.b32.xlu1 %v2911_v42, %s2585_s12  ;;  %1027 = vrot.lane.b32.xlu0 %v2913_v43, %s2585_s12  ;;  %v660_v5 = vrot.slane %v3071_v32, 1  ;;  %4622 = vst [vmem:[#allocation13_spill] sm:$0xff] %v3090_v11  ;;  %v3101_v22 = vld [vmem:[#allocation2 + $0xb8] sm:$0x3] }
 0x10a   : > { %v3078_v3 = vsel %vm631_vm4, %v653_v16, %v655_v31  ;;  %v673_v16 = vrot.slane %v2935_v48, 1  ;;  %v678_v31 = vrot.slane %v2943_v50, 1  ;;  %v670_v33 = vrot.slane %v3101_v22, 1 }
 0x10b   : > { %4621 = vst [vmem:[#allocation12_spill] sm:$0xff] %v3078_v3  ;;  %v3093_v13 = vsel %vm631_vm4, %v658_v19, %v660_v5  ;;  %v3108_v19 = vsel %vm631_vm4, %v663_v30, %v665_v17  ;;  %v3116_v5 = vld [vmem:[#allocation2 + $0xd0] sm:$0x3]  ;;  %v683_v17 = vrot.slane %v2951_v52, 1 }
 0x10c   : > { %4623 = vst [vmem:[#allocation14_spill] sm:$0xff] %v3093_v13  ;;  %v3105_v27 = vsel %vm631_vm4, %v672_v10, %v673_v16  ;;  %4625 = vst [vmem:[#allocation16_spill] sm:$0xff] %v3108_v19  ;;  %v3120_v10 = vsel %vm631_vm4, %v677_v23, %v678_v31  ;;  %v3123_v30 = vsel %vm631_vm4, %v668_v4, %v670_v33  ;;  %v675_v24 = vrot.slane %v3116_v5, 1 }
 0x10d   : > { %1033 = vrot.lane.b32.xlu1 %v2919_v44, %s2585_s12  ;;  %1031 = vrot.lane.b32.xlu0 %v2921_v45, %s2585_s12  ;;  %4624 = vst [vmem:[#allocation15_spill] sm:$0xff] %v3105_v27  ;;  %4626 = vst [vmem:[#allocation17_spill] sm:$0xff] %v3120_v10  ;;  %v3135_v23 = vsel %vm631_vm4, %v682_v26, %v683_v17  ;;  %v688_v33 = vrot.slane %v2959_v54, 1  ;;  %v692_v26 = vrot.slane %v2969_v57, 1 }
 0x10e   : > { %4627 = vst [vmem:[#allocation18_spill] sm:$0xff] %v3123_v30  ;;  %4628 = vst [vmem:[#allocation19_spill] sm:$0xff] %v3135_v23  ;;  %v3138_v4 = vsel %vm631_vm4, %v673_v16, %v675_v24  ;;  %v693_v16 = vrot.slane %v2967_v56, 1 }
 0x10f   : > { %4629 = vst [vmem:[#allocation20_spill] sm:$0xff] %v3138_v4 }
 0x111   : > { %1037 = vrot.lane.b32.xlu1 %v2927_v46, %s2585_s12  ;;  %1035 = vrot.lane.b32.xlu0 %v2929_v47, %s2585_s12 }
 0x115   : > { %1041 = vrot.lane.b32.xlu1 %v2935_v48, %s2585_s12  ;;  %1039 = vrot.lane.b32.xlu0 %v2937_v49, %s2585_s12 }
 0x119   : > { %1045 = vrot.lane.b32.xlu1 %v2943_v50, %s2585_s12  ;;  %1043 = vrot.lane.b32.xlu0 %v2945_v51, %s2585_s12 }
 0x11d   : > { %1049 = vrot.lane.b32.xlu1 %v2951_v52, %s2585_s12  ;;  %1047 = vrot.lane.b32.xlu0 %v2953_v53, %s2585_s12 }
 0x121   : > { %1053 = vrot.lane.b32.xlu1 %v2959_v54, %s2585_s12  ;;  %1051 = vrot.lane.b32.xlu0 %v2961_v55, %s2585_s12 }
 0x125   : > { %1057 = vrot.lane.b32.xlu1 %v2967_v56, %s2585_s12  ;;  %1055 = vrot.lane.b32.xlu0 %v2969_v57, %s2585_s12 }
 0x129   : > { %1061 = vrot.lane.b32.xlu1 %v2975_v58, %s2585_s12  ;;  %1059 = vrot.lane.b32.xlu0 %v2977_v59, %s2585_s12 }
 0x12d   : > { %1065 = vrot.lane.b32.xlu1 %v2983_v60, %s2585_s12  ;;  %1063 = vrot.lane.b32.xlu0 %v2985_v61, %s2585_s12 }
 0x131   : > { %1069 = vrot.lane.b32.xlu1 %v2991_v62, %s2585_s12  ;;  %1067 = vrot.lane.b32.xlu0 %v2993_v63, %s2585_s12 }
 0x135   : > { %1073 = vrot.lane.b32.xlu1 %v2999_v0, %s2585_s12  ;;  %1071 = vrot.lane.b32.xlu0 %v3001_v1, %s2585_s12  ;;  %v3131_v1 = vld [vmem:[#allocation2 + $0xe8] sm:$0x3]  ;;  %v687_v0 = vrot.slane %v2961_v55, 1 }
 0x139   : > { %827 = vrot.lane.b32.xlu0 %v3015_v8, %s2583_s28  ;;  %823 = vrot.lane.b32.xlu1 %v3018_v9, %s2583_s28 }
 0x13d   : > { %831 = vrot.lane.b32.xlu0 %v3030_v14, %s2583_s28  ;;  %825 = vrot.lane.b32.xlu1 %v3033_v15, %s2583_s28 }
 0x141   : > { %835 = vrot.lane.b32.xlu0 %v3045_v20, %s2583_s28  ;;  %829 = vrot.lane.b32.xlu1 %v3048_v21, %s2583_s28 }
 0x145   : > { %839 = vrot.lane.b32.xlu0 %v3060_v28, %s2583_s28  ;;  %833 = vrot.lane.b32.xlu1 %v3063_v29, %s2583_s28  ;;  %v719_v29 = vrot.slane %v2875_v34, 2 }
 0x149   : > { %843 = vrot.lane.b32.xlu0 %v3075_v2, %s2583_s28  ;;  %837 = vrot.lane.b32.xlu1 %v3078_v3, %s2583_s28  ;;  %v3199_v3 = vld [vmem:[#allocation2 + $0x148] sm:$0x3]  ;;  %v708_v2 = vrot.slane %v2991_v62, 1 }
 0x14d   : > { %847 = vrot.lane.b32.xlu0 %v3090_v11, %s2583_s28  ;;  %841 = vrot.lane.b32.xlu1 %v3093_v13, %s2583_s28 }
 0x151   : > { %851 = vrot.lane.b32.xlu0 %v3105_v27, %s2583_s28  ;;  %845 = vrot.lane.b32.xlu1 %v3108_v19, %s2583_s28  ;;  %v680_v19 = vrot.slane %v3131_v1, 1  ;;  %v3152_v27 = vsel %vm631_vm4, %v687_v0, %v688_v33  ;;  %v697_v0 = vrot.slane %v2977_v59, 1 }
 0x152   : > { %4631 = vst [vmem:[#allocation22_spill] sm:$0xff] %v3152_v27 }
 0x153   : > { %v3155_v24 = vsel %vm631_vm4, %v678_v31, %v680_v19  ;;  %v698_v31 = vrot.slane %v2975_v58, 1 }
 0x154   : > { %4632 = vst [vmem:[#allocation23_spill] sm:$0xff] %v3155_v24 }
 0x155   : > { %855 = vrot.lane.b32.xlu0 %v3120_v10, %s2583_s28  ;;  %849 = vrot.lane.b32.xlu1 %v3123_v30, %s2583_s28  ;;  %v3146_v30 = vpop.permute.xlu0 %819  ;;  %v3148_v10 = vld [vmem:[#allocation2 + $0x100] sm:$0x3] }
 0x156   : > { %4630 = vst [vmem:[#allocation21_spill] sm:$0xff] %v3146_v30  ;;  %v685_v13 = vrot.slane %v3148_v10, 1  ;;  %v3163_v30 = vld [vmem:[#allocation2 + $0x118] sm:$0x3] }
 0x157   : > { %v690_v11 = vrot.slane %v3163_v30, 1 }
 0x158   : > { %v3172_v19 = vsel %vm631_vm4, %v683_v17, %v685_v13  ;;  %v703_v17 = vrot.slane %v2983_v60, 1 }
 0x159   : > { %859 = vrot.lane.b32.xlu0 %v3135_v23, %s2583_s28  ;;  %853 = vrot.lane.b32.xlu1 %v3138_v4, %s2583_s28  ;;  %v3165_v4 = vpop.permute.xlu0 %821  ;;  %v3169_v23 = vsel %vm631_vm4, %v692_v26, %v693_v16  ;;  %4635 = vst [vmem:[#allocation26_spill] sm:$0xff] %v3172_v19  ;;  %v3184_v26 = vsel %vm631_vm4, %v697_v0, %v698_v31  ;;  %v707_v0 = vrot.slane %v2993_v63, 1 }
 0x15a   : > { %4633 = vst [vmem:[#allocation24_spill] sm:$0xff] %v3165_v4  ;;  %4634 = vst [vmem:[#allocation25_spill] sm:$0xff] %v3169_v23  ;;  %v702_v4 = vrot.slane %v2985_v61, 1  ;;  %v3187_v13 = vsel %vm631_vm4, %v688_v33, %v690_v11 }
 0x15b   : > { %4636 = vst [vmem:[#allocation27_spill] sm:$0xff] %v3184_v26  ;;  %4637 = vst [vmem:[#allocation28_spill] sm:$0xff] %v3187_v13 }
 0x15c   : > { %v3203_v11 = vsel %vm631_vm4, %v702_v4, %v703_v17  ;;  %v718_v4 = vrot.slane %v2877_v35, 2 }
 0x15d   : > { %863 = vrot.lane.b32.xlu0 %v3152_v27, %s2583_s28  ;;  %857 = vrot.lane.b32.xlu1 %v3155_v24, %s2583_s28  ;;  %v3180_v24 = vld [vmem:[#allocation2 + $0x130] sm:$0x3]  ;;  %4640 = vst [vmem:[#allocation31_spill] sm:$0xff] %v3203_v11 }
 0x15e   : > { %v695_v27 = vrot.slane %v3180_v24, 1 }
 0x160   : > { %v3206_v33 = vsel %vm631_vm4, %v693_v16, %v695_v27  ;;  %v3222_v27 = vsel %vm631_vm4, %v707_v0, %v708_v2  ;;  %v723_v0 = vrot.slane %v2889_v37, 2 }
 0x161   : > { %867 = vrot.lane.b32.xlu0 %v3169_v23, %s2583_s28  ;;  %861 = vrot.lane.b32.xlu1 %v3172_v19, %s2583_s28  ;;  %v3195_v19 = vpop.permute.xlu1 %917  ;;  %v3197_v23 = vpop.permute.xlu0 %915  ;;  %4643 = vst [vmem:[#allocation34_spill] sm:$0xff] %v3222_v27 }
 0x162   : > { %4638 = vst [vmem:[#allocation29_spill] sm:$0xff] %v3195_v19  ;;  %4639 = vst [vmem:[#allocation30_spill] sm:$0xff] %v3197_v23  ;;  %v3214_v19 = vld [vmem:[#allocation2 + $0x160] sm:$0x3] }
 0x165   : > { %871 = vrot.lane.b32.xlu0 %v3184_v26, %s2583_s28  ;;  %865 = vrot.lane.b32.xlu1 %v3187_v13, %s2583_s28  ;;  %v700_v26 = vrot.slane %v3199_v3, 1 }
 0x167   : > { %v3225_v16 = vsel %vm631_vm4, %v698_v31, %v700_v26  ;;  %v3241_v31 = vsel %vm712_vm6, %v718_v4, %v719_v29  ;;  %v724_v26 = vrot.slane %v2887_v36, 2  ;;  %v728_v4 = vrot.slane %v2897_v39, 2 }
 0x168   : > { %v721_v36 = vrot.slane %v3011_v6, 2  ;;  %v734_v6 = vrot.slane %v2903_v40, 2 }
 0x169   : > { %875 = vrot.lane.b32.xlu0 %v3203_v11, %s2583_s28  ;;  %869 = vrot.lane.b32.xlu1 %v3206_v33, %s2583_s28  ;;  %v705_v11 = vrot.slane %v3214_v19, 1  ;;  %v3258_v37 = vsel %vm712_vm6, %v723_v0, %v724_v26  ;;  %v733_v0 = vrot.slane %v2905_v41, 2 }
 0x16b   : > { %v3216_v23 = vpop.permute.xlu1 %1013  ;;  %v3218_v13 = vpop.permute.xlu0 %1011  ;;  %v3244_v34 = vsel %vm631_vm4, %v703_v17, %v705_v11  ;;  %v729_v11 = vrot.slane %v2895_v38, 2  ;;  %v3292_v41 = vsel %vm712_vm6, %v733_v0, %v734_v6 }
 0x16c   : > { %4641 = vst [vmem:[#allocation32_spill] sm:$0xff] %v3216_v23  ;;  %4642 = vst [vmem:[#allocation33_spill] sm:$0xff] %v3218_v13  ;;  %v3233_v23 = vld [vmem:[#allocation2 + $0x178] sm:$0x3] }
 0x16d   : > { %879 = vrot.lane.b32.xlu0 %v3222_v27, %s2583_s28  ;;  %873 = vrot.lane.b32.xlu1 %v3225_v16, %s2583_s28  ;;  %v710_v27 = vrot.slane %v3233_v23, 1  ;;  %v3275_v39 = vsel %vm712_vm6, %v728_v4, %v729_v11  ;;  %v738_v4 = vrot.slane %v2913_v43, 2  ;;  %v743_v43 = vrot.slane %v2921_v45, 2 }
 0x16e   : > { %v748_v45 = vrot.slane %v2929_v47, 2  ;;  %v753_v47 = vrot.slane %v2937_v49, 2  ;;  %v758_v49 = vrot.slane %v2945_v51, 2 }
 0x16f   : > { %v3235_v13 = vpop.permute.xlu1 %1017  ;;  %v3237_v35 = vpop.permute.xlu0 %1015  ;;  %v3261_v17 = vsel %vm631_vm4, %v708_v2, %v710_v27  ;;  %v3278_v2 = vsel %vm712_vm6, %v719_v29, %v721_v36  ;;  %v726_v27 = vrot.slane %v3026_v12, 2  ;;  %v739_v12 = vrot.slane %v2911_v42, 2 }
 0x170   : > { %4644 = vst [vmem:[#allocation35_spill] sm:$0xff] %v3235_v13  ;;  %4645 = vst [vmem:[#allocation36_spill] sm:$0xff] %v3237_v35  ;;  %v731_v29 = vrot.slane %v3041_v18, 2  ;;  %v744_v42 = vrot.slane %v2919_v44, 2  ;;  %v736_v18 = vrot.slane %v3056_v25, 2  ;;  %v749_v44 = vrot.slane %v2927_v46, 2 }
 0x171   : > { %919 = vrot.lane.b32.xlu0 %v3241_v31, %s2584_s5  ;;  %877 = vrot.lane.b32.xlu1 %v3244_v34, %s2583_s28  ;;  %4648 = vst [vmem:[#allocation39_spill] sm:$0xff] %v3261_v17  ;;  %v3295_v36 = vsel %vm712_vm6, %v724_v26, %v726_v27  ;;  %v3309_v0 = vsel %vm712_vm6, %v738_v4, %v739_v12  ;;  %v741_v25 = vrot.slane %v3071_v32, 2  ;;  %v754_v46 = vrot.slane %v2935_v48, 2 }
 0x172   : > { %v3312_v26 = vsel %vm712_vm6, %v729_v11, %v731_v29  ;;  %v3326_v4 = vsel %vm712_vm6, %v743_v43, %v744_v42  ;;  %v3329_v11 = vsel %vm712_vm6, %v734_v6, %v736_v18  ;;  %v3343_v43 = vsel %vm712_vm6, %v748_v45, %v749_v44 }
 0x173   : > { %v3252_v13 = vpop.permute.xlu1 %1021  ;;  %v3254_v35 = vpop.permute.xlu0 %1019  ;;  %4657 = vst [vmem:[#allocation48_spill] sm:$0xff] %v3326_v4  ;;  %4658 = vst [vmem:[#allocation49_spill] sm:$0xff] %v3343_v43  ;;  %v3346_v6 = vsel %vm712_vm6, %v739_v12, %v741_v25  ;;  %v746_v32 = vrot.slane %v3086_v7, 2  ;;  %v3360_v45 = vsel %vm712_vm6, %v753_v47, %v754_v46  ;;  %v759_v48 = vrot.slane %v2943_v50, 2 }
 0x174   : > { %4646 = vst [vmem:[#allocation37_spill] sm:$0xff] %v3252_v13  ;;  %4647 = vst [vmem:[#allocation38_spill] sm:$0xff] %v3254_v35  ;;  %v751_v7 = vrot.slane %v3101_v22, 2  ;;  %v763_v47 = vrot.slane %v2953_v53, 2  ;;  %v764_v22 = vrot.slane %v2951_v52, 2 }
 0x175   : > { %923 = vrot.lane.b32.xlu0 %v3258_v37, %s2584_s5  ;;  %881 = vrot.lane.b32.xlu1 %v3261_v17, %s2583_s28  ;;  %4661 = vst [vmem:[#allocation52_spill] sm:$0xff] %v3360_v45  ;;  %v3363_v12 = vsel %vm712_vm6, %v744_v42, %v746_v32  ;;  %v756_v32 = vrot.slane %v3116_v5, 2  ;;  %v769_v5 = vrot.slane %v2959_v54, 2 }
 0x176   : > { %4662 = vst [vmem:[#allocation53_spill] sm:$0xff] %v3363_v12  ;;  %v3380_v42 = vsel %vm712_vm6, %v749_v44, %v751_v7  ;;  %v761_v7 = vrot.slane %v3131_v1, 2  ;;  %v774_v1 = vrot.slane %v2967_v56, 2 }
 0x177   : > { %v3269_v13 = vpop.permute.xlu1 %1025  ;;  %v3271_v35 = vpop.permute.xlu0 %1023  ;;  %4665 = vst [vmem:[#allocation56_spill] sm:$0xff] %v3380_v42  ;;  %v3397_v44 = vsel %vm712_vm6, %v754_v46, %v756_v32  ;;  %v766_v32 = vrot.slane %v3148_v10, 2  ;;  %v779_v10 = vrot.slane %v2975_v58, 2  ;;  %v784_v58 = vrot.slane %v2983_v60, 2 }
 0x178   : > { %4649 = vst [vmem:[#allocation40_spill] sm:$0xff] %v3269_v13  ;;  %4650 = vst [vmem:[#allocation41_spill] sm:$0xff] %v3271_v35  ;;  %v3414_v46 = vsel %vm712_vm6, %v759_v48, %v761_v7  ;;  %v771_v7 = vrot.slane %v3163_v30, 2  ;;  %v776_v30 = vrot.slane %v3180_v24, 2  ;;  %v789_v60 = vrot.slane %v2991_v62, 2 }
 0x179   : > { %927 = vrot.lane.b32.xlu0 %v3275_v39, %s2584_s5  ;;  %921 = vrot.lane.b32.xlu1 %v3278_v2, %s2584_s5  ;;  %v781_v24 = vrot.slane %v3199_v3, 2  ;;  %v786_v62 = vrot.slane %v3214_v19, 2 }
 0x17b   : > { %v3286_v13 = vpop.permute.xlu1 %1029  ;;  %v3288_v35 = vpop.permute.xlu0 %1027 }
 0x17c   : > { %4651 = vst [vmem:[#allocation42_spill] sm:$0xff] %v3286_v13  ;;  %4652 = vst [vmem:[#allocation43_spill] sm:$0xff] %v3288_v35 }
 0x17d   : > { %931 = vrot.lane.b32.xlu0 %v3292_v41, %s2584_s5  ;;  %925 = vrot.lane.b32.xlu1 %v3295_v36, %s2584_s5 }
 0x17f   : > { %v3303_v13 = vpop.permute.xlu1 %1033  ;;  %v3305_v35 = vpop.permute.xlu0 %1031 }
 0x180   : > { %4653 = vst [vmem:[#allocation44_spill] sm:$0xff] %v3303_v13  ;;  %4654 = vst [vmem:[#allocation45_spill] sm:$0xff] %v3305_v35 }
 0x181   : > { %935 = vrot.lane.b32.xlu0 %v3309_v0, %s2584_s5  ;;  %929 = vrot.lane.b32.xlu1 %v3312_v26, %s2584_s5 }
 0x183   : > { %v3320_v27 = vpop.permute.xlu1 %1037  ;;  %v3322_v13 = vpop.permute.xlu0 %1035 }
 0x184   : > { %4655 = vst [vmem:[#allocation46_spill] sm:$0xff] %v3320_v27  ;;  %4656 = vst [vmem:[#allocation47_spill] sm:$0xff] %v3322_v13 }
 0x185   : > { %939 = vrot.lane.b32.xlu0 %v3326_v4, %s2584_s5  ;;  %933 = vrot.lane.b32.xlu1 %v3329_v11, %s2584_s5 }
 0x187   : > { %v3337_v29 = vpop.permute.xlu1 %1041  ;;  %v3339_v27 = vpop.permute.xlu0 %1039 }
 0x189   : > { %943 = vrot.lane.b32.xlu0 %v3343_v43, %s2584_s5  ;;  %937 = vrot.lane.b32.xlu1 %v3346_v6, %s2584_s5  ;;  %v3377_v43 = vsel %vm712_vm6, %v758_v49, %v759_v48  ;;  %v768_v49 = vrot.slane %v2961_v55, 2  ;;  %v3431_v48 = vsel %vm712_vm6, %v764_v22, %v766_v32 }
 0x18b   : > { %v3354_v18 = vpop.permute.xlu1 %1045  ;;  %v3356_v13 = vpop.permute.xlu0 %1043 }
 0x18c   : > { %4659 = vst [vmem:[#allocation50_spill] sm:$0xff] %v3354_v18  ;;  %4660 = vst [vmem:[#allocation51_spill] sm:$0xff] %v3356_v13  ;;  %v4721_v18 = vld [vmem:[#allocation26_spill] sm:$0xff] }
 0x18d   : > { %947 = vrot.lane.b32.xlu0 %v3360_v45, %s2584_s5  ;;  %941 = vrot.lane.b32.xlu1 %v3363_v12, %s2584_s5  ;;  %v3394_v12 = vsel %vm712_vm6, %v763_v47, %v764_v22  ;;  %v773_v47 = vrot.slane %v2969_v57, 2  ;;  %v3448_v22 = vsel %vm712_vm6, %v769_v5, %v771_v7 }
 0x18f   : > { %v3371_v25 = vpop.permute.xlu1 %1049  ;;  %v3373_v35 = vpop.permute.xlu0 %1047  ;;  %v3428_v4 = vsel %vm712_vm6, %v773_v47, %v774_v1 }
 0x190   : > { %4663 = vst [vmem:[#allocation54_spill] sm:$0xff] %v3371_v25  ;;  %4664 = vst [vmem:[#allocation55_spill] sm:$0xff] %v3373_v35 }
 0x191   : > { %951 = vrot.lane.b32.xlu0 %v3377_v43, %s2584_s5  ;;  %945 = vrot.lane.b32.xlu1 %v3380_v42, %s2584_s5  ;;  %v3411_v42 = vsel %vm712_vm6, %v768_v49, %v769_v5  ;;  %v778_v49 = vrot.slane %v2977_v59, 2  ;;  %v783_v59 = vrot.slane %v2985_v61, 2  ;;  %v788_v61 = vrot.slane %v2993_v63, 2 }
 0x192   : > { %v3465_v5 = vsel %vm712_vm6, %v774_v1, %v776_v30  ;;  %v3481_v1 = vsel %vm712_vm6, %v779_v10, %v781_v24  ;;  %v3493_v30 = vsel %vm712_vm6, %v784_v58, %v786_v62 }
 0x193   : > { %v3388_v25 = vpop.permute.xlu1 %1053  ;;  %v3390_v35 = vpop.permute.xlu0 %1051  ;;  %v3445_v47 = vsel %vm712_vm6, %v778_v49, %v779_v10  ;;  %v3462_v49 = vsel %vm712_vm6, %v783_v59, %v784_v58  ;;  %v3478_v63 = vsel %vm712_vm6, %v788_v61, %v789_v60  ;;  %4681 = vst [vmem:[#allocation72_spill] sm:$0xff] %v3481_v1  ;;  %4684 = vst [vmem:[#allocation75_spill] sm:$0xff] %v3493_v30  ;;  %v791_v61 = vrot.slane %v3233_v23, 2 }
 0x194   : > { %4666 = vst [vmem:[#allocation57_spill] sm:$0xff] %v3388_v25  ;;  %4667 = vst [vmem:[#allocation58_spill] sm:$0xff] %v3390_v35 }
 0x195   : > { %955 = vrot.lane.b32.xlu0 %v3394_v12, %s2584_s5  ;;  %949 = vrot.lane.b32.xlu1 %v3397_v44, %s2584_s5  ;;  %4674 = vst [vmem:[#allocation65_spill] sm:$0xff] %v3445_v47  ;;  %4677 = vst [vmem:[#allocation68_spill] sm:$0xff] %v3462_v49  ;;  %v3505_v24 = vsel %vm712_vm6, %v789_v60, %v791_v61 }
 0x196   : > { %4680 = vst [vmem:[#allocation71_spill] sm:$0xff] %v3478_v63  ;;  %4687 = vst [vmem:[#allocation78_spill] sm:$0xff] %v3505_v24 }
 0x197   : > { %v3405_v25 = vpop.permute.xlu1 %1057  ;;  %v3407_v35 = vpop.permute.xlu0 %1055 }
 0x198   : > { %4668 = vst [vmem:[#allocation59_spill] sm:$0xff] %v3405_v25  ;;  %4669 = vst [vmem:[#allocation60_spill] sm:$0xff] %v3407_v35 }
 0x199   : > { %959 = vrot.lane.b32.xlu0 %v3411_v42, %s2584_s5  ;;  %953 = vrot.lane.b32.xlu1 %v3414_v46, %s2584_s5 }
 0x19b   : > { %v3422_v25 = vpop.permute.xlu1 %1061  ;;  %v3424_v35 = vpop.permute.xlu0 %1059 }
 0x19c   : > { %4670 = vst [vmem:[#allocation61_spill] sm:$0xff] %v3422_v25  ;;  %4671 = vst [vmem:[#allocation62_spill] sm:$0xff] %v3424_v35 }
 0x19d   : > { %963 = vrot.lane.b32.xlu0 %v3428_v4, %s2584_s5  ;;  %957 = vrot.lane.b32.xlu1 %v3431_v48, %s2584_s5 }
 0x19f   : > { %v3439_v25 = vpop.permute.xlu1 %1065  ;;  %v3441_v35 = vpop.permute.xlu0 %1063 }
 0x1a0   : > { %4672 = vst [vmem:[#allocation63_spill] sm:$0xff] %v3439_v25  ;;  %4673 = vst [vmem:[#allocation64_spill] sm:$0xff] %v3441_v35  ;;  %v4697_v35 = vld [vmem:[#allocation12_spill] sm:$0xff] }
 0x1a1   : > { %967 = vrot.lane.b32.xlu0 %v3445_v47, %s2584_s5  ;;  %961 = vrot.lane.b32.xlu1 %v3448_v22, %s2584_s5  ;;  %v4732_v47 = vld [vmem:[#allocation34_spill] sm:$0xff] }
 0x1a3   : > { %v3456_v32 = vpop.permute.xlu1 %1069  ;;  %v3458_v25 = vpop.permute.xlu0 %1067 }
 0x1a4   : > { %4675 = vst [vmem:[#allocation66_spill] sm:$0xff] %v3456_v32  ;;  %4676 = vst [vmem:[#allocation67_spill] sm:$0xff] %v3458_v25  ;;  %v4696_v32 = vld [vmem:[#allocation11_spill] sm:$0xff] }
 0x1a5   : > { %971 = vrot.lane.b32.xlu0 %v3462_v49, %s2584_s5  ;;  %965 = vrot.lane.b32.xlu1 %v3465_v5, %s2584_s5  ;;  %v4717_v49 = vld [vmem:[#allocation23_spill] sm:$0xff] }
 0x1a7   : > { %v3473_v7 = vpop.permute.xlu1 %1073  ;;  %v3475_v25 = vpop.permute.xlu0 %1071 }
 0x1a8   : > { %4678 = vst [vmem:[#allocation69_spill] sm:$0xff] %v3473_v7  ;;  %4679 = vst [vmem:[#allocation70_spill] sm:$0xff] %v3475_v25  ;;  %v4694_v7 = vld [vmem:[#allocation10_spill] sm:$0xff] }
 0x1a9   : > { %975 = vrot.lane.b32.xlu0 %v3478_v63, %s2584_s5  ;;  %969 = vrot.lane.b32.xlu1 %v3481_v1, %s2584_s5  ;;  %v4709_v63 = vld [vmem:[#allocation18_spill] sm:$0xff] }
 0x1ab   : > { %v3488_v3 = vpop.permute.xlu0 %827  ;;  %v3490_v59 = vpop.permute.xlu1 %823 }
 0x1ac   : > { %4682 = vst [vmem:[#allocation73_spill] sm:$0xff] %v3488_v3  ;;  %4683 = vst [vmem:[#allocation74_spill] sm:$0xff] %v3490_v59  ;;  %v4716_v59 = vld [vmem:[#allocation22_spill] sm:$0xff] }
 0x1ad   : > { %1107 = vrot.lane.b32.xlu0 %v3018_v9, %s2586_s13  ;;  %973 = vrot.lane.b32.xlu1 %v3493_v30, %s2584_s5 }
 0x1af   : > { %v3500_v19 = vpop.permute.xlu0 %831  ;;  %v3502_v10 = vpop.permute.xlu1 %825 }
 0x1b0   : > { %4685 = vst [vmem:[#allocation76_spill] sm:$0xff] %v3500_v19  ;;  %4686 = vst [vmem:[#allocation77_spill] sm:$0xff] %v3502_v10  ;;  %v4702_v19 = vld [vmem:[#allocation14_spill] sm:$0xff]  ;;  %v4712_v10 = vld [vmem:[#allocation19_spill] sm:$0xff] }
 0x1b1   : > { %1111 = vrot.lane.b32.xlu0 %v3015_v8, %s2586_s13  ;;  %977 = vrot.lane.b32.xlu1 %v3505_v24, %s2584_s5  ;;  %v4704_v24 = vld [vmem:[#allocation15_spill] sm:$0xff] }
 0x1b3   : > { %v3511_v23 = vpop.permute.xlu0 %835  ;;  %v3513_v58 = vpop.permute.xlu1 %829 }
 0x1b4   : > { %4688 = vst [vmem:[#allocation79_spill] sm:$0xff] %v3511_v23  ;;  %4689 = vst [vmem:[#allocation80_spill] sm:$0xff] %v3513_v58 }
 0x1b5   : > { %1115 = vrot.lane.b32.xlu0 %v3030_v14, %s2586_s13  ;;  %1109 = vrot.lane.b32.xlu1 %v3033_v15, %s2586_s13 }
 0x1b7   : > { %v3519_v9 = vpop.permute.xlu0 %839  ;;  %v3521_v60 = vpop.permute.xlu1 %833 }
 0x1b8   : > { %4690 = vst [vmem:[#allocation81_spill] sm:$0xff] %v3519_v9  ;;  %4691 = vst [vmem:[#allocation82_spill] sm:$0xff] %v3521_v60  ;;  %v4701_v60 = vld [vmem:[#allocation13_spill] sm:$0xff] }
 0x1b9   : > { %1119 = vrot.lane.b32.xlu0 %v3045_v20, %s2586_s13  ;;  %1113 = vrot.lane.b32.xlu1 %v3048_v21, %s2586_s13 }
 0x1bb   : > { %v3527_v62 = vpop.permute.xlu0 %843  ;;  %v3529_v61 = vpop.permute.xlu1 %837 }
 0x1bc   : > { %4692 = vst [vmem:[#allocation83_spill] sm:$0xff] %v3527_v62  ;;  %4693 = vst [vmem:[#allocation84_spill] sm:$0xff] %v3529_v61 }
 0x1bd   : > { %1123 = vrot.lane.b32.xlu0 %v3060_v28, %s2586_s13  ;;  %1117 = vrot.lane.b32.xlu1 %v4694_v7, %s2586_s13 }
 0x1bf   : > { %v3535_v15 = vpop.permute.xlu0 %847  ;;  %v3537_v25 = vpop.permute.xlu1 %841 }
 0x1c0   : > { %4695 = vst [vmem:[#allocation10_spill] sm:$0xff] %v3537_v25 }
 0x1c1   : > { %1127 = vrot.lane.b32.xlu0 %v4696_v32, %s2586_s13  ;;  %1121 = vrot.lane.b32.xlu1 %v4697_v35, %s2586_s13 }
 0x1c2   : > { %v3543_v9 = vpop.f32.mrb[0].mxu1 }
 0x1c3   : > { %4698 = vst [vmem:[#allocation12_spill] sm:$0xff] %v3543_v9  ;;  %v3545_v62 = vpop.permute.xlu0 %851  ;;  %v3547_v61 = vpop.permute.xlu1 %845  ;;  %v4705_v9 = vld [vmem:[#allocation16_spill] sm:$0xff] }
 0x1c4   : > { %4699 = vst [vmem:[#allocation85_spill] sm:$0xff] %v3545_v62  ;;  %4700 = vst [vmem:[#allocation86_spill] sm:$0xff] %v3547_v61  ;;  %v2438_v23 = vpop.f32.mrb[1].mxu1  ;;  %v4731_v62 = vld [vmem:[#allocation9_spill] sm:$0xff] }
 0x1c5   : > { %1131 = vrot.lane.b32.xlu0 %v4701_v60, %s2586_s13  ;;  %1125 = vrot.lane.b32.xlu1 %v4702_v19, %s2586_s13  ;;  %v4708_v23 = vld [vmem:[#allocation17_spill] sm:$0xff]  ;;  %v796_v1 = vrot.slane %v4731_v62, 1 }
 0x1c7   : > { %v3553_v25 = vpop.permute.xlu0 %855  ;;  %v3555_v58 = vpop.permute.xlu1 %849 }
 0x1c8   : > { %4703 = vst [vmem:[#allocation14_spill] sm:$0xff] %v3553_v25 }
 0x1c9   : > { %1135 = vrot.lane.b32.xlu0 %v4704_v24, %s2586_s13  ;;  %1129 = vrot.lane.b32.xlu1 %v4705_v9, %s2586_s13  ;;  %v4713_v24 = vld [vmem:[#allocation20_spill] sm:$0xff] }
 0x1ca   : > { %v4725_v9 = vld [vmem:[#allocation28_spill] sm:$0xff] }
 0x1cb   : > { %v3561_v3 = vpop.permute.xlu0 %859  ;;  %v3563_v61 = vpop.permute.xlu1 %853 }
 0x1cc   : > { %4706 = vst [vmem:[#allocation87_spill] sm:$0xff] %v3561_v3  ;;  %4707 = vst [vmem:[#allocation88_spill] sm:$0xff] %v3563_v61 }
 0x1cd   : > { %1139 = vrot.lane.b32.xlu0 %v4708_v23, %s2586_s13  ;;  %1133 = vrot.lane.b32.xlu1 %v4709_v63, %s2586_s13 }
 0x1cf   : > { %v3569_v60 = vpop.permute.xlu0 %863  ;;  %v3571_v25 = vpop.permute.xlu1 %857 }
 0x1d0   : > { %4710 = vst [vmem:[#allocation17_spill] sm:$0xff] %v3569_v60  ;;  %4711 = vst [vmem:[#allocation89_spill] sm:$0xff] %v3571_v25  ;;  %v4720_v25 = vld [vmem:[#allocation25_spill] sm:$0xff] }
 0x1d1   : > { %1143 = vrot.lane.b32.xlu0 %v4712_v10, %s2586_s13  ;;  %1137 = vrot.lane.b32.xlu1 %v4713_v24, %s2586_s13 }
 0x1d3   : > { %v3577_v30 = vpop.permute.xlu0 %867  ;;  %v3579_v3 = vpop.permute.xlu1 %861 }
 0x1d4   : > { %4714 = vst [vmem:[#allocation19_spill] sm:$0xff] %v3577_v30  ;;  %4715 = vst [vmem:[#allocation90_spill] sm:$0xff] %v3579_v3  ;;  %v4724_v3 = vld [vmem:[#allocation27_spill] sm:$0xff] }
 0x1d5   : > { %1147 = vrot.lane.b32.xlu0 %v4716_v59, %s2586_s13  ;;  %1141 = vrot.lane.b32.xlu1 %v4717_v49, %s2586_s13 }
 0x1d7   : > { %v3585_v63 = vpop.permute.xlu0 %871  ;;  %v3587_v60 = vpop.permute.xlu1 %865 }
 0x1d8   : > { %4718 = vst [vmem:[#allocation22_spill] sm:$0xff] %v3585_v63  ;;  %4719 = vst [vmem:[#allocation23_spill] sm:$0xff] %v3587_v60  ;;  %v4728_v60 = vld [vmem:[#allocation31_spill] sm:$0xff] }
 0x1d9   : > { %1151 = vrot.lane.b32.xlu0 %v4720_v25, %s2586_s13  ;;  %1145 = vrot.lane.b32.xlu1 %v4721_v18, %s2586_s13 }
 0x1db   : > { %v3593_v24 = vpop.permute.xlu0 %875  ;;  %v3595_v30 = vpop.permute.xlu1 %869 }
 0x1dc   : > { %4722 = vst [vmem:[#allocation25_spill] sm:$0xff] %v3593_v24  ;;  %4723 = vst [vmem:[#allocation26_spill] sm:$0xff] %v3595_v30  ;;  %v4730_v30 = vld [vmem:[#allocation8_spill] sm:$0xff] }
 0x1dd   : > { %1155 = vrot.lane.b32.xlu0 %v4724_v3, %s2586_s13  ;;  %1149 = vrot.lane.b32.xlu1 %v4725_v9, %s2586_s13  ;;  %v797_v13 = vrot.slane %v4730_v30, 1  ;;  %v3630_v30 = vld [vmem:[#allocation2 + $0x190] sm:$0x3] }
 0x1de   : > { %4736 = vst [vmem:[#allocation93_spill] sm:$0xff] %v3630_v30 }
 0x1df   : > { %v3601_v61 = vpop.permute.xlu0 %879  ;;  %v3603_v63 = vpop.permute.xlu1 %873 }
 0x1e0   : > { %4726 = vst [vmem:[#allocation27_spill] sm:$0xff] %v3601_v61  ;;  %4727 = vst [vmem:[#allocation28_spill] sm:$0xff] %v3603_v63 }
 0x1e1   : > { %1159 = vrot.lane.b32.xlu0 %v4728_v60, %s2586_s13  ;;  %1153 = vrot.lane.b32.xlu1 %v3206_v33, %s2586_s13  ;;  %v3624_v60 = vsel %vm631_vm4, %v796_v1, %v797_v13  ;;  %v1849_v1 = vld [vmem:[%s4535_s2 + $0x21] sm:$0xff] }
 0x1e2   : > { %4735 = vst [vmem:[#allocation92_spill] sm:$0xff] %v3624_v60 }
 0x1e3   : > { %v3609_v32 = vpop.permute.xlu0 %919  ;;  %v3611_v24 = vpop.permute.xlu1 %877 }
 0x1e4   : > { %4729 = vst [vmem:[#allocation91_spill] sm:$0xff] %v3611_v24 }
 0x1e5   : > { %1163 = vrot.lane.b32.xlu0 %v4732_v47, %s2586_s13  ;;  %1157 = vrot.lane.b32.xlu1 %v3225_v16, %s2586_s13  ;;  %v799_v47 = vrot.slane %v3630_v30, 1 }
 0x1e7   : > { %v3619_v61 = vpop.permute.xlu0 %923  ;;  %v3621_v63 = vpop.permute.xlu1 %881 }
 0x1e8   : > { %4733 = vst [vmem:[#allocation8_spill] sm:$0xff] %v3619_v61  ;;  %4734 = vst [vmem:[#allocation9_spill] sm:$0xff] %v3621_v63  ;;  %v1850_v63 = vld [vmem:[%s4535_s2 + $0x29] sm:$0xff]  ;;  %v3652_v61 = vsel %vm631_vm4, %v797_v13, %v799_v47  ;;  %v1851_v13 = vld [vmem:[%s4535_s2 + $0x31] sm:$0xff] }
 0x1e9   : > { %1167 = vrot.lane.b32.xlu0 %v3624_v60, %s2586_s13  ;;  %1161 = vrot.lane.b32.xlu1 %v3244_v34, %s2586_s13  ;;  %v2503_v30 = vpack.c.bf16 %v1850_v63, %v1849_v1  ;;  %v1852_v47 = vld [vmem:[%s4535_s2 + $0x39] sm:$0xff] }
 0x1eb   : > { %v3632_v62 = vpop.permute.xlu0 %927  ;;  %v3634_v24 = vpop.permute.xlu1 %921  ;;  %2511 = vmatprep.subr.bf16.mxu1 %v2503_v30  ;;  %2504 = vmatprep.subr.bf16.mxu0 %v2503_v30 }
 0x1ec   : > { %4737 = vst [vmem:[#allocation94_spill] sm:$0xff] %v3632_v62  ;;  %2514 = vmatpush3.bf16.msra.mxu1 %v2503_v30  ;;  %2506 = vmatpush3.bf16.msra.mxu0 %v2503_v30  ;;  %v1853_v30 = vld [vmem:[%s4535_s2 + $0x41] sm:$0xf] }
 0x1ed   : > { %1231 = vrot.lane.b32.xlu0 %v3360_v45, %s2587_s14  ;;  %1165 = vrot.lane.b32.xlu1 %v3261_v17, %s2586_s13 }
 0x1ef   : > { %v3647_v62 = vpop.permute.xlu0 %931  ;;  %v3649_v60 = vpop.permute.xlu1 %925 }
 0x1f1   : > { %1327 = vrot.lane.b32.xlu0 %v2945_v51, %s2588_s21  ;;  %1169 = vrot.lane.b32.xlu1 %v3652_v61, %s2586_s13  ;;  %v2507_v51 = vpack.c.bf16 %v1852_v47, %v1851_v13 }
 0x1f3   : > { %v3658_v45 = vpop.permute.xlu0 %935  ;;  %v3660_v17 = vpop.permute.xlu1 %929  ;;  %2512 = vmatprep.subr.bf16.mxu1 %v2507_v51  ;;  %2508 = vmatprep.subr.bf16.mxu0 %v2507_v51 }
 0x1f4   : > { %4738 = vst [vmem:[#allocation95_spill] sm:$0xff] %v3658_v45  ;;  %2515 = vmatpush3.bf16.msra.mxu1 %v2507_v51  ;;  %2510 = vmatpush3.bf16.msra.mxu0 %v2507_v51 }
 0x1f5   : > { %1423 = vrot.lane.b32.xlu0 %v4708_v23, %s2589_s26  ;;  %1233 = vrot.lane.b32.xlu1 %v3397_v44, %s2587_s14 }
 0x1f6   : > { %2513 = vmatprep.subr.msk.mxu1 %vm298_vm5, %v1853_v30  ;;  %2447 = vmatprep.subr.msk.mxu0 %vm298_vm5, %v1853_v30 }
 0x1f7   : > { %v3672_v63 = vpop.permute.xlu0 %939  ;;  %v3674_v1 = vpop.permute.xlu1 %933 }
 0x1f8   : > { %4739 = vst [vmem:[#allocation96_spill] sm:$0xff] %v3672_v63  ;;  %2516 = vmatpush3.msk.msra.mxu1 %vm298_vm5, %v1853_v30  ;;  %2448 = vmatpush3.msk.msra.mxu0 %vm298_vm5, %v1853_v30  ;;  %v4742_v30 = vld [vmem:[#allocation5_spill] sm:$0xff] }
 0x1f9   : > { %1519 = vrot.lane.b32.xlu0 %v3377_v43, %s2590_s29  ;;  %1329 = vrot.lane.b32.xlu1 %v2943_v50, %s2588_s21 }
 0x1fb   : > { %v3685_v23 = vpop.permute.xlu0 %943  ;;  %v3687_v13 = vpop.permute.xlu1 %937 }
 0x1fc   : > { %4740 = vst [vmem:[#allocation97_spill] sm:$0xff] %v3687_v13 }
 0x1fd   : > { %1235 = vrot.lane.b32.xlu0 %v3377_v43, %s2587_s14  ;;  %1425 = vrot.lane.b32.xlu1 %v4717_v49, %s2589_s26 }
 0x1ff   : > { %v3695_v47 = vpop.permute.xlu0 %947  ;;  %v3697_v50 = vpop.permute.xlu1 %941 }
 0x200   : > { %4741 = vst [vmem:[#allocation98_spill] sm:$0xff] %v3697_v50  ;;  %v4743_v50 = vld [vmem:[#allocation4_spill] sm:$0xff] }
 0x201   : > { %1205 = vrot.lane.b32.xlu0 %v3278_v2, %s2587_s14  ;;  %1203 = vrot.lane.b32.xlu1 %v3241_v31, %s2587_s14 }
 0x203   : > { %v3703_v51 = vpop.permute.xlu0 %951  ;;  %v3705_v63 = vpop.permute.xlu1 %945 }
 0x205   : > { %1299 = vrot.lane.b32.xlu0 %v4742_v30, %s2588_s21  ;;  %1521 = vrot.lane.b32.xlu1 %v3414_v46, %s2590_s29 }
 0x207   : > { %v3711_v43 = vpop.permute.xlu0 %955  ;;  %v3713_v49 = vpop.permute.xlu1 %949 }
 0x209   : > { %1301 = vrot.lane.b32.xlu0 %v4743_v50, %s2588_s21  ;;  %1237 = vrot.lane.b32.xlu1 %v3414_v46, %s2587_s14 }
 0x20b   : > { %v3719_v31 = vpop.permute.xlu0 %959  ;;  %v3721_v2 = vpop.permute.xlu1 %953 }
 0x20d   : > { %1395 = vrot.lane.b32.xlu0 %v3015_v8, %s2589_s26  ;;  %1331 = vrot.lane.b32.xlu1 %v2953_v53, %s2588_s21 }
 0x20f   : > { %v3727_v30 = vpop.permute.xlu0 %963  ;;  %v3729_v13 = vpop.permute.xlu1 %957 }
 0x211   : > { %1397 = vrot.lane.b32.xlu0 %v3048_v21, %s2589_s26  ;;  %1333 = vrot.lane.b32.xlu1 %v2951_v52, %s2588_s21 }
 0x213   : > { %v3735_v46 = vpop.permute.xlu0 %967  ;;  %v3737_v50 = vpop.permute.xlu1 %961 }
 0x214   : > { %4744 = vst [vmem:[#allocation5_spill] sm:$0xff] %v3735_v46 }
 0x215   : > { %1491 = vrot.lane.b32.xlu0 %v3258_v37, %s2590_s29  ;;  %1427 = vrot.lane.b32.xlu1 %v4712_v10, %s2589_s26 }
 0x217   : > { %v3743_v53 = vpop.permute.xlu0 %971  ;;  %v3745_v8 = vpop.permute.xlu1 %965 }
 0x218   : > { %4745 = vst [vmem:[#allocation4_spill] sm:$0xff] %v3743_v53 }
 0x219   : > { %1207 = vrot.lane.b32.xlu0 %v3258_v37, %s2587_s14  ;;  %1429 = vrot.lane.b32.xlu1 %v4721_v18, %s2589_s26 }
 0x21b   : > { %v3751_v52 = vpop.permute.xlu0 %975  ;;  %v3753_v21 = vpop.permute.xlu1 %969 }
 0x21c   : > { %4746 = vst [vmem:[#allocation99_spill] sm:$0xff] %v3751_v52  ;;  %4747 = vst [vmem:[#allocation100_spill] sm:$0xff] %v3753_v21  ;;  %v4750_v52 = vld [vmem:[#allocation6_spill] sm:$0xff] }
 0x21d   : > { %1493 = vrot.lane.b32.xlu0 %v3295_v36, %s2590_s29  ;;  %1523 = vrot.lane.b32.xlu1 %v3394_v12, %s2590_s29 }
 0x21f   : > { %v3759_v10 = vpop.permute.xlu0 %1107  ;;  %v3761_v53 = vpop.permute.xlu1 %973 }
 0x220   : > { %4748 = vst [vmem:[#allocation101_spill] sm:$0xff] %v3761_v53 }
 0x221   : > { %1209 = vrot.lane.b32.xlu0 %v3295_v36, %s2587_s14  ;;  %1239 = vrot.lane.b32.xlu1 %v3394_v12, %s2587_s14 }
 0x223   : > { %v3767_v37 = vpop.permute.xlu0 %1111  ;;  %v3769_v18 = vpop.permute.xlu1 %977 }
 0x224   : > { %4749 = vst [vmem:[#allocation102_spill] sm:$0xff] %v3769_v18 }
 0x225   : > { %1303 = vrot.lane.b32.xlu0 %v4750_v52, %s2588_s21  ;;  %1525 = vrot.lane.b32.xlu1 %v3431_v48, %s2590_s29 }
 0x227   : > { %v3775_v21 = vpop.permute.xlu0 %1115  ;;  %v3777_v46 = vpop.permute.xlu1 %1109 }
 0x229   : > { %1305 = vrot.lane.b32.xlu0 %v2895_v38, %s2588_s21  ;;  %1241 = vrot.lane.b32.xlu1 %v3431_v48, %s2587_s14 }
 0x22b   : > { %v3783_v36 = vpop.permute.xlu0 %1119  ;;  %v3785_v12 = vpop.permute.xlu1 %1113 }
 0x22d   : > { %1399 = vrot.lane.b32.xlu0 %v3030_v14, %s2589_s26  ;;  %1335 = vrot.lane.b32.xlu1 %v2961_v55, %s2588_s21 }
 0x22f   : > { %v3791_v52 = vpop.permute.xlu0 %1123  ;;  %v3793_v18 = vpop.permute.xlu1 %1117 }
 0x231   : > { %1401 = vrot.lane.b32.xlu0 %v4694_v7, %s2589_s26  ;;  %1337 = vrot.lane.b32.xlu1 %v2959_v54, %s2588_s21 }
 0x233   : > { %v3799_v38 = vpop.permute.xlu0 %1127  ;;  %v3801_v48 = vpop.permute.xlu1 %1121 }
 0x234   : > { %4751 = vst [vmem:[#allocation6_spill] sm:$0xff] %v3799_v38 }
 0x235   : > { %1495 = vrot.lane.b32.xlu0 %v3275_v39, %s2590_s29  ;;  %1431 = vrot.lane.b32.xlu1 %v4716_v59, %s2589_s26 }
 0x237   : > { %v3807_v55 = vpop.permute.xlu0 %1131  ;;  %v3809_v14 = vpop.permute.xlu1 %1125 }
 0x238   : > { %4752 = vst [vmem:[#allocation103_spill] sm:$0xff] %v3807_v55  ;;  %v4755_v55 = vld [vmem:[#allocation7_spill] sm:$0xff] }
 0x239   : > { %1211 = vrot.lane.b32.xlu0 %v3275_v39, %s2587_s14  ;;  %1433 = vrot.lane.b32.xlu1 %v4725_v9, %s2589_s26 }
 0x23b   : > { %v1136_v54 = vpop.permute.xlu0 %1135  ;;  %v3815_v7 = vpop.permute.xlu1 %1129 }
 0x23c   : > { %4753 = vst [vmem:[#allocation104_spill] sm:$0xff] %v3815_v7 }
 0x23d   : > { %1497 = vrot.lane.b32.xlu0 %v3312_v26, %s2590_s29  ;;  %1527 = vrot.lane.b32.xlu1 %v3411_v42, %s2590_s29 }
 0x23f   : > { %v3821_v59 = vpop.permute.xlu0 %1139  ;;  %v3823_v53 = vpop.permute.xlu1 %1133 }
 0x240   : > { %4754 = vst [vmem:[#allocation105_spill] sm:$0xff] %v3823_v53 }
 0x241   : > { %1213 = vrot.lane.b32.xlu0 %v3312_v26, %s2587_s14  ;;  %1243 = vrot.lane.b32.xlu1 %v3411_v42, %s2587_s14 }
 0x243   : > { %v3829_v39 = vpop.permute.xlu0 %1143  ;;  %v3831_v9 = vpop.permute.xlu1 %1137 }
 0x245   : > { %1307 = vrot.lane.b32.xlu0 %v4755_v55, %s2588_s21  ;;  %1529 = vrot.lane.b32.xlu1 %v3448_v22, %s2590_s29 }
 0x247   : > { %v3837_v7 = vpop.permute.xlu0 %1147  ;;  %v3839_v38 = vpop.permute.xlu1 %1141 }
 0x249   : > { %1309 = vrot.lane.b32.xlu0 %v2903_v40, %s2588_s21  ;;  %1245 = vrot.lane.b32.xlu1 %v3448_v22, %s2587_s14 }
 0x24b   : > { %v3845_v26 = vpop.permute.xlu0 %1151  ;;  %v3847_v42 = vpop.permute.xlu1 %1145 }
 0x24d   : > { %1403 = vrot.lane.b32.xlu0 %v3045_v20, %s2589_s26  ;;  %1339 = vrot.lane.b32.xlu1 %v2969_v57, %s2588_s21 }
 0x24f   : > { %v3853_v55 = vpop.permute.xlu0 %1155  ;;  %v3855_v53 = vpop.permute.xlu1 %1149 }
 0x251   : > { %1405 = vrot.lane.b32.xlu0 %v4697_v35, %s2589_s26  ;;  %1341 = vrot.lane.b32.xlu1 %v2967_v56, %s2588_s21 }
 0x253   : > { %v3861_v40 = vpop.permute.xlu0 %1159  ;;  %v3863_v22 = vpop.permute.xlu1 %1153 }
 0x254   : > { %4756 = vst [vmem:[#allocation7_spill] sm:$0xff] %v3861_v40 }
 0x255   : > { %1499 = vrot.lane.b32.xlu0 %v3292_v41, %s2590_s29  ;;  %1435 = vrot.lane.b32.xlu1 %v4720_v25, %s2589_s26 }
 0x257   : > { %v3869_v57 = vpop.permute.xlu0 %1163  ;;  %v3871_v20 = vpop.permute.xlu1 %1157 }
 0x258   : > { %4757 = vst [vmem:[#allocation106_spill] sm:$0xff] %v3869_v57 }
 0x259   : > { %1215 = vrot.lane.b32.xlu0 %v3292_v41, %s2587_s14  ;;  %1437 = vrot.lane.b32.xlu1 %v3206_v33, %s2589_s26  ;;  %v3891_v41 = vld [vmem:[#allocation2 + $0xa8] sm:$0xff] }
 0x25a   : > { %v1601_v33 = vsel %vm294_vm2, %v3891_v41, %v3535_v15 }
 0x25b   : > { %v3877_v56 = vpop.permute.xlu0 %1167  ;;  %v3879_v35 = vpop.permute.xlu1 %1161  ;;  %v1634_v40 = vsel %vm1619_vm7, %v1601_v33, %v3685_v23  ;;  %v3910_v33 = vld [vmem:[#allocation2 + $0x80] sm:$0xff] }
 0x25c   : > { %4758 = vst [vmem:[#allocation107_spill] sm:$0xff] %v3877_v56  ;;  %4759 = vst [vmem:[#allocation108_spill] sm:$0xff] %v3879_v35 }
 0x25d   : > { %1501 = vrot.lane.b32.xlu0 %v3329_v11, %s2590_s29  ;;  %1531 = vrot.lane.b32.xlu1 %v3428_v4, %s2590_s29 }
 0x25f   : > { %v1232_v25 = vpop.permute.xlu0 %1231  ;;  %v3885_v57 = vpop.permute.xlu1 %1165 }
 0x260   : > { %4760 = vst [vmem:[#allocation109_spill] sm:$0xff] %v3885_v57  ;;  %v3900_v57 = vld [vmem:[#allocation2 + $0x78] sm:$0xff] }
 0x261   : > { %1217 = vrot.lane.b32.xlu0 %v3329_v11, %s2587_s14  ;;  %1247 = vrot.lane.b32.xlu1 %v3428_v4, %s2587_s14  ;;  %4762 = vst [vmem:[#allocation111_spill] sm:$0xff] %v3900_v57  ;;  %v1667_v4 = vsel %vm1652_vm8, %v1634_v40, %v3339_v27 }
 0x263   : > { %v1328_v56 = vpop.permute.xlu0 %1327  ;;  %v3896_v35 = vpop.permute.xlu1 %1169 }
 0x264   : > { %4761 = vst [vmem:[#allocation110_spill] sm:$0xff] %v3896_v35  ;;  %v1700_v35 = vsel %vm1685_vm10, %v1667_v4, %v1136_v54 }
 0x265   : > { %1311 = vrot.lane.b32.xlu0 %v3900_v57, %s2588_s21  ;;  %1533 = vrot.lane.b32.xlu1 %v3465_v5, %s2590_s29  ;;  %v1733_v23 = vsel %vm1718_vm9, %v1700_v35, %v1232_v25  ;;  %v3921_v35 = vld [vmem:[#allocation2 + $0x138] sm:$0xff] }
 0x266   : > { %v1766_v45 = vsel %vm1751_vm11, %v1733_v23, %v1328_v56  ;;  %4763 = vst [vmem:[#allocation112_spill] sm:$0xff] %v3921_v35 }
 0x267   : > { %v1424_v11 = vpop.permute.xlu0 %1423  ;;  %v1234_v15 = vpop.permute.xlu1 %1233 }
 0x268   : > { %v1799_v27 = vsel %vm1784_vm12, %v1766_v45, %v1424_v11 }
 0x269   : > { %1313 = vrot.lane.b32.xlu0 %v3910_v33, %s2588_s21  ;;  %1249 = vrot.lane.b32.xlu1 %v3465_v5, %s2587_s14  ;;  %v3926_v5 = vld [vmem:[#allocation2 + $0xb0] sm:$0xff] }
 0x26a   : > { %v1602_v45 = vsel %vm294_vm2, %v3926_v5, %v3555_v58 }
 0x26b   : > { %v1520_v40 = vpop.permute.xlu0 %1519  ;;  %v1330_v57 = vpop.permute.xlu1 %1329  ;;  %v1635_v4 = vsel %vm1619_vm7, %v1602_v45, %v3705_v63 }
 0x26c   : > { %v1831_v54 = vsel %vm218_vm1, %v1799_v27, %v1520_v40  ;;  %v1668_v11 = vsel %vm1652_vm8, %v1635_v4, %v3337_v29 }
 0x26d   : > { %1407 = vrot.lane.b32.xlu0 %v3060_v28, %s2589_s26  ;;  %1343 = vrot.lane.b32.xlu1 %v3921_v35, %s2588_s21  ;;  %v3935_v28 = vld [vmem:[#allocation2 + $0x140] sm:$0xff]  ;;  %v1701_v58 = vsel %vm1685_vm10, %v1668_v11, %v3831_v9 }
 0x26e   : > { %2470 = vmatprep.mubr.msk.f32.mxu1 %vm1854_vm13, %v1831_v54  ;;  %4764 = vst [vmem:[#allocation113_spill] sm:$0xff] %v3935_v28  ;;  %v1734_v40 = vsel %vm1718_vm9, %v1701_v58, %v1234_v15 }
 0x26f   : > { %v1236_v56 = vpop.permute.xlu0 %1235  ;;  %v1426_v25 = vpop.permute.xlu1 %1425 }
 0x271   : > { %1409 = vrot.lane.b32.xlu0 %v4702_v19, %s2589_s26  ;;  %1345 = vrot.lane.b32.xlu1 %v3935_v28, %s2588_s21  ;;  %v1767_v19 = vsel %vm1751_vm11, %v1734_v40, %v1330_v57  ;;  %v2544_v57 = vld [vmem:[#allocation2] sm:$0xff] }
 0x272   : > { %v1800_v63 = vsel %vm1784_vm12, %v1767_v19, %v1426_v25  ;;  %v4766_v25 = vld [vmem:[#allocation21_spill] sm:$0xff] }
 0x273   : > { %v1206_v23 = vpop.permute.xlu0 %1205  ;;  %v1204_v27 = vpop.permute.xlu1 %1203  ;;  %v1587_v4 = vsel %vm294_vm2, %v2544_v57, %v4766_v25  ;;  %v4768_v40 = vld [vmem:[#allocation33_spill] sm:$0xff]  ;;  %v3975_v25 = vld [vmem:[#allocation2 + $0x90] sm:$0xff] }
 0x274   : > { %v4772_v28 = vld [vmem:[#allocation85_spill] sm:$0xff] }
 0x275   : > { %1503 = vrot.lane.b32.xlu0 %v3309_v0, %s2590_s29  ;;  %1439 = vrot.lane.b32.xlu1 %v4724_v3, %s2589_s26  ;;  %v4765_v3 = vld [vmem:[#allocation65_spill] sm:$0xff] }
 0x276   : > { %4769 = vst [vmem:[#allocation65_spill] sm:$0xff] %v3975_v25 }
 0x277   : > { %v1300_v54 = vpop.permute.xlu0 %1299  ;;  %v1522_v45 = vpop.permute.xlu1 %1521 }
 0x278   : > { %v1832_v29 = vsel %vm218_vm1, %v1800_v63, %v1522_v45 }
 0x279   : > { %1219 = vrot.lane.b32.xlu0 %v3309_v0, %s2587_s14  ;;  %1441 = vrot.lane.b32.xlu1 %v3225_v16, %s2589_s26  ;;  %v4767_v16 = vld [vmem:[#allocation30_spill] sm:$0xff] }
 0x27a   : > { %2471 = vmatmul.mubr.msk.f32.vlgmr.msra.gmra.mrb[2].mxu1 %vm1854_vm13, %v1832_v29  ;;  %v1620_v58 = vsel %vm1619_vm7, %v1587_v4, %v4767_v16  ;;  %v2546_v4 = vld [vmem:[#allocation2 + $0x8] sm:$0xff]  ;;  %v4771_v16 = vld [vmem:[#allocation24_spill] sm:$0xff] }
 0x27b   : > { %v1302_v9 = vpop.permute.xlu0 %1301  ;;  %v3956_v15 = vpop.permute.xlu1 %1237  ;;  %v1653_v19 = vsel %vm1652_vm8, %v1620_v58, %v4768_v40  ;;  %v1588_v58 = vsel %vm294_vm2, %v2546_v4, %v4771_v16  ;;  %v3984_v40 = vld [vmem:[#allocation2 + $0xc0] sm:$0xff]  ;;  %v4775_v4 = vld [vmem:[#allocation51_spill] sm:$0xff] }
 0x27c   : > { %v1686_v29 = vsel %vm1685_vm10, %v1653_v19, %v3759_v10  ;;  %v1603_v10 = vsel %vm294_vm2, %v3984_v40, %v4772_v28 }
 0x27d   : > { %1505 = vrot.lane.b32.xlu0 %v3346_v6, %s2590_s29  ;;  %1535 = vrot.lane.b32.xlu1 %v4765_v3, %s2590_s29  ;;  %v1719_v57 = vsel %vm1718_vm9, %v1686_v29, %v1204_v27 }
 0x27f   : > { %v1396_v11 = vpop.permute.xlu0 %1395  ;;  %v1332_v0 = vpop.permute.xlu1 %1331 }
 0x281   : > { %1221 = vrot.lane.b32.xlu0 %v3346_v6, %s2587_s14  ;;  %1251 = vrot.lane.b32.xlu1 %v4765_v3, %s2587_s14  ;;  %v4770_v6 = vld [vmem:[#allocation72_spill] sm:$0xff]  ;;  %v1752_v3 = vsel %vm1751_vm11, %v1719_v57, %v1300_v54  ;;  %v4773_v57 = vld [vmem:[#allocation29_spill] sm:$0xff] }
 0x282   : > { %v1785_v27 = vsel %vm1784_vm12, %v1752_v3, %v1396_v11  ;;  %v3993_v54 = vld [vmem:[#allocation2 + $0x98] sm:$0xff]  ;;  %v1621_v28 = vsel %vm1619_vm7, %v1588_v58, %v4773_v57  ;;  %v4014_v57 = vld [vmem:[#allocation2 + $0x150] sm:$0xff] }
 0x283   : > { %v1398_v63 = vpop.permute.xlu0 %1397  ;;  %v1334_v45 = vpop.permute.xlu1 %1333  ;;  %v4774_v11 = vld [vmem:[#allocation32_spill] sm:$0xff] }
 0x284   : > { %v1654_v3 = vsel %vm1652_vm8, %v1621_v28, %v4774_v11  ;;  %v4777_v11 = vld [vmem:[#allocation88_spill] sm:$0xff] }
 0x285   : > { %1315 = vrot.lane.b32.xlu0 %v3975_v25, %s2588_s21  ;;  %1537 = vrot.lane.b32.xlu1 %v4770_v6, %s2590_s29  ;;  %v1636_v25 = vsel %vm1619_vm7, %v1603_v10, %v3695_v47 }
 0x286   : > { %v1669_v47 = vsel %vm1652_vm8, %v1636_v25, %v4775_v4 }
 0x287   : > { %v1492_v19 = vpop.permute.xlu0 %1491  ;;  %v1428_v29 = vpop.permute.xlu1 %1427 }
 0x288   : > { %v1817_v35 = vsel %vm218_vm1, %v1785_v27, %v1492_v19  ;;  %v1687_v27 = vsel %vm1685_vm10, %v1654_v3, %v3777_v46  ;;  %v1702_v19 = vsel %vm1685_vm10, %v1669_v47, %v3821_v59  ;;  %v4020_v46 = vld [vmem:[#allocation2 + $0xc8] sm:$0xff] }
 0x289   : > { %1317 = vrot.lane.b32.xlu0 %v3993_v54, %s2588_s21  ;;  %1253 = vrot.lane.b32.xlu1 %v4770_v6, %s2587_s14  ;;  %v1735_v6 = vsel %vm1718_vm9, %v1702_v19, %v1236_v56  ;;  %v1720_v58 = vsel %vm1718_vm9, %v1687_v27, %v1206_v23  ;;  %v1604_v59 = vsel %vm294_vm2, %v4020_v46, %v4777_v11  ;;  %v4033_v19 = vld [vmem:[#allocation2 + $0x158] sm:$0xff] }
 0x28a   : > { %2449 = vmatprep.mubr.msk.f32.mxu0 %vm1854_vm13, %v1817_v35  ;;  %v4776_v35 = vld [vmem:[#allocation11_spill] sm:$0xff]  ;;  %v1753_v25 = vsel %vm1751_vm11, %v1720_v58, %v1302_v9  ;;  %v1768_v28 = vsel %vm1751_vm11, %v1735_v6, %v1332_v0  ;;  %v1637_v47 = vsel %vm1619_vm7, %v1604_v59, %v3713_v49  ;;  %v4778_v0 = vld [vmem:[#allocation16_spill] sm:$0xff] }
 0x28b   : > { %v1208_v16 = vpop.permute.xlu0 %1207  ;;  %v1430_v10 = vpop.permute.xlu1 %1429  ;;  %v1786_v56 = vsel %vm1784_vm12, %v1753_v25, %v1398_v63  ;;  %v1801_v23 = vsel %vm1784_vm12, %v1768_v28, %v1428_v29  ;;  %v4779_v63 = vld [vmem:[#allocation50_spill] sm:$0xff]  ;;  %v4780_v25 = vld [vmem:[#allocation48_spill] sm:$0xff]  ;;  %v4781_v28 = vld [vmem:[#allocation31_spill] sm:$0xff] }
 0x28c   : > { %v1670_v29 = vsel %vm1652_vm8, %v1637_v47, %v4779_v63  ;;  %v4784_v47 = vld [vmem:[#allocation74_spill] sm:$0xff]  ;;  %v4785_v63 = vld [vmem:[#allocation36_spill] sm:$0xff] }
 0x28d   : > { %1411 = vrot.lane.b32.xlu0 %v4776_v35, %s2589_s26  ;;  %1347 = vrot.lane.b32.xlu1 %v4014_v57, %s2588_s21  ;;  %v1703_v58 = vsel %vm1685_vm10, %v1670_v29, %v3839_v38 }
 0x28e   : > { %v1736_v35 = vsel %vm1718_vm9, %v1703_v58, %v3956_v15 }
 0x28f   : > { %v1494_v3 = vpop.permute.xlu0 %1493  ;;  %v1524_v4 = vpop.permute.xlu1 %1523  ;;  %v1769_v11 = vsel %vm1751_vm11, %v1736_v35, %v1334_v45  ;;  %v4783_v45 = vld [vmem:[#allocation68_spill] sm:$0xff] }
 0x290   : > { %v1818_v27 = vsel %vm218_vm1, %v1786_v56, %v1494_v3  ;;  %v1833_v9 = vsel %vm218_vm1, %v1801_v23, %v1524_v4  ;;  %v1802_v59 = vsel %vm1784_vm12, %v1769_v11, %v1430_v10  ;;  %v4782_v4 = vld [vmem:[#allocation53_spill] sm:$0xff]  ;;  %v2552_v10 = vld [vmem:[#allocation2 + $0x18] sm:$0xff] }
 0x291   : > { %1413 = vrot.lane.b32.xlu0 %v4778_v0, %s2589_s26  ;;  %1349 = vrot.lane.b32.xlu1 %v4033_v19, %s2588_s21 }
 0x292   : > { %2450 = vmatmul.mubr.msk.f32.vlgmr.msra.gmra.mrb[2].mxu0 %vm1854_vm13, %v1818_v27  ;;  %2473 = vmatprep.mubr.msk.f32.mxu1 %vm1854_vm13, %v1833_v9  ;;  %v1589_v27 = vsel %vm294_vm2, %v2552_v10, %v4784_v47 }
 0x293   : > { %v1210_v49 = vpop.permute.xlu0 %1209  ;;  %v1240_v6 = vpop.permute.xlu1 %1239 }
 0x295   : > { %1507 = vrot.lane.b32.xlu0 %v4780_v25, %s2590_s29  ;;  %1443 = vrot.lane.b32.xlu1 %v4781_v28, %s2589_s26 }
 0x297   : > { %v1304_v56 = vpop.permute.xlu0 %1303  ;;  %v1526_v23 = vpop.permute.xlu1 %1525 }
 0x298   : > { %v1834_v3 = vsel %vm218_vm1, %v1802_v59, %v1526_v23  ;;  %v2553_v59 = vld [vmem:[#allocation2 + $0x20] sm:$0xff] }
 0x299   : > { %1223 = vrot.lane.b32.xlu0 %v4780_v25, %s2587_s14  ;;  %1445 = vrot.lane.b32.xlu1 %v3244_v34, %s2589_s26  ;;  %v1622_v34 = vsel %vm1619_vm7, %v1589_v27, %v3609_v32  ;;  %v4786_v32 = vld [vmem:[#allocation75_spill] sm:$0xff]  ;;  %v4787_v23 = vld [vmem:[#allocation77_spill] sm:$0xff] }
 0x29a   : > { %2474 = vmatmul.mubr.msk.f32.gmra.mrb[4].mxu1 %vm1854_vm13, %v1834_v3  ;;  %v1655_v29 = vsel %vm1652_vm8, %v1622_v34, %v4785_v63  ;;  %v1590_v3 = vsel %vm294_vm2, %v2553_v59, %v4787_v23  ;;  %v4789_v34 = vld [vmem:[#allocation35_spill] sm:$0xff]  ;;  %v4108_v59 = vld [vmem:[#allocation2 + $0x168] sm:$0xff] }
 0x29b   : > { %v1306_v38 = vpop.permute.xlu0 %1305  ;;  %v4057_v15 = vpop.permute.xlu1 %1241  ;;  %v1688_v25 = vsel %vm1685_vm10, %v1655_v29, %v3767_v37  ;;  %v4790_v63 = vld [vmem:[#allocation55_spill] sm:$0xff] }
 0x29c   : > { %v1721_v28 = vsel %vm1718_vm9, %v1688_v25, %v1208_v16 }
 0x29d   : > { %1509 = vrot.lane.b32.xlu0 %v4782_v4, %s2590_s29  ;;  %1539 = vrot.lane.b32.xlu1 %v4783_v45, %s2590_s29  ;;  %v1754_v11 = vsel %vm1751_vm11, %v1721_v28, %v1304_v56 }
 0x29f   : > { %v1400_v9 = vpop.permute.xlu0 %1399  ;;  %v1336_v0 = vpop.permute.xlu1 %1335 }
 0x2a0   : > { %v1787_v37 = vsel %vm1784_vm12, %v1754_v11, %v1400_v9  ;;  %v4791_v11 = vld [vmem:[#allocation13_spill] sm:$0xff] }
 0x2a1   : > { %1225 = vrot.lane.b32.xlu0 %v4782_v4, %s2587_s14  ;;  %1255 = vrot.lane.b32.xlu1 %v4783_v45, %s2587_s14  ;;  %v2554_v4 = vld [vmem:[#allocation2 + $0xd8] sm:$0xff]  ;;  %v4788_v45 = vld [vmem:[#allocation14_spill] sm:$0xff] }
 0x2a2   : > { %v1605_v10 = vsel %vm294_vm2, %v2554_v4, %v4788_v45  ;;  %v4792_v4 = vld [vmem:[#allocation89_spill] sm:$0xff] }
 0x2a3   : > { %v1402_v58 = vpop.permute.xlu0 %1401  ;;  %v1338_v35 = vpop.permute.xlu1 %1337  ;;  %v1638_v27 = vsel %vm1619_vm7, %v1605_v10, %v3703_v51 }
 0x2a4   : > { %v1671_v29 = vsel %vm1652_vm8, %v1638_v27, %v4790_v63  ;;  %v4796_v63 = vld [vmem:[#allocation34_spill] sm:$0xff] }
 0x2a5   : > { %1319 = vrot.lane.b32.xlu0 %v3891_v41, %s2588_s21  ;;  %1541 = vrot.lane.b32.xlu1 %v4786_v32, %s2590_s29  ;;  %v1623_v41 = vsel %vm1619_vm7, %v1590_v3, %v3634_v24  ;;  %v1704_v28 = vsel %vm1685_vm10, %v1671_v29, %v3829_v39 }
 0x2a6   : > { %v1656_v9 = vsel %vm1652_vm8, %v1623_v41, %v4789_v34 }
 0x2a7   : > { %v1496_v47 = vpop.permute.xlu0 %1495  ;;  %v1432_v16 = vpop.permute.xlu1 %1431  ;;  %v1689_v51 = vsel %vm1685_vm10, %v1656_v9, %v3785_v12  ;;  %v2556_v12 = vld [vmem:[#allocation2 + $0xe0] sm:$0xff] }
 0x2a8   : > { %v1819_v56 = vsel %vm218_vm1, %v1787_v37, %v1496_v47  ;;  %v1606_v39 = vsel %vm294_vm2, %v2556_v12, %v4792_v4  ;;  %v4795_v9 = vld [vmem:[#allocation49_spill] sm:$0xff] }
 0x2a9   : > { %1321 = vrot.lane.b32.xlu0 %v3926_v5, %s2588_s21  ;;  %1257 = vrot.lane.b32.xlu1 %v4786_v32, %s2587_s14  ;;  %v1722_v5 = vsel %vm1718_vm9, %v1689_v51, %v1210_v49  ;;  %v1737_v32 = vsel %vm1718_vm9, %v1704_v28, %v1240_v6  ;;  %v1639_v37 = vsel %vm1619_vm7, %v1606_v39, %v3721_v2 }
 0x2aa   : > { %2452 = vmatprep.mubr.msk.f32.mxu0 %vm1854_vm13, %v1819_v56  ;;  %v1755_v23 = vsel %vm1751_vm11, %v1722_v5, %v1306_v38  ;;  %v1770_v3 = vsel %vm1751_vm11, %v1737_v32, %v1336_v0  ;;  %v4793_v38 = vld [vmem:[#allocation18_spill] sm:$0xff]  ;;  %v4124_v0 = vld [vmem:[#allocation2 + $0x170] sm:$0xff] }
 0x2ab   : > { %v1212_v24 = vpop.permute.xlu0 %1211  ;;  %v1434_v25 = vpop.permute.xlu1 %1433  ;;  %v1788_v49 = vsel %vm1784_vm12, %v1755_v23, %v1402_v58  ;;  %v1803_v6 = vsel %vm1784_vm12, %v1770_v3, %v1432_v16  ;;  %v4794_v58 = vld [vmem:[#allocation54_spill] sm:$0xff]  ;;  %v4798_v23 = vld [vmem:[#allocation56_spill] sm:$0xff]  ;;  %v4800_v3 = vld [vmem:[#allocation73_spill] sm:$0xff] }
 0x2ac   : > { %v1672_v16 = vsel %vm1652_vm8, %v1639_v37, %v4794_v58  ;;  %v4803_v58 = vld [vmem:[#allocation78_spill] sm:$0xff] }
 0x2ad   : > { %1415 = vrot.lane.b32.xlu0 %v4791_v11, %s2589_s26  ;;  %1351 = vrot.lane.b32.xlu1 %v4108_v59, %s2588_s21  ;;  %v1705_v56 = vsel %vm1685_vm10, %v1672_v16, %v3847_v42  ;;  %v4797_v42 = vld [vmem:[#allocation39_spill] sm:$0xff] }
 0x2ae   : > { %v1738_v34 = vsel %vm1718_vm9, %v1705_v56, %v4057_v15  ;;  %v2559_v56 = vld [vmem:[#allocation2 + $0x38] sm:$0xff] }
 0x2af   : > { %v1498_v45 = vpop.permute.xlu0 %1497  ;;  %v1528_v10 = vpop.permute.xlu1 %1527  ;;  %v1771_v29 = vsel %vm1751_vm11, %v1738_v34, %v1338_v35  ;;  %v4799_v35 = vld [vmem:[#allocation71_spill] sm:$0xff]  ;;  %v4804_v34 = vld [vmem:[#allocation80_spill] sm:$0xff] }
 0x2b0   : > { %v1820_v47 = vsel %vm218_vm1, %v1788_v49, %v1498_v45  ;;  %v1835_v41 = vsel %vm218_vm1, %v1803_v6, %v1528_v10  ;;  %v1804_v51 = vsel %vm1784_vm12, %v1771_v29, %v1434_v25  ;;  %v2558_v25 = vld [vmem:[#allocation2 + $0x30] sm:$0xff]  ;;  %v4801_v49 = vld [vmem:[#allocation8_spill] sm:$0xff]  ;;  %v4802_v45 = vld [vmem:[#allocation38_spill] sm:$0xff] }
 0x2b1   : > { %1417 = vrot.lane.b32.xlu0 %v4793_v38, %s2589_s26  ;;  %1353 = vrot.lane.b32.xlu1 %v4124_v0, %s2588_s21  ;;  %v1591_v12 = vsel %vm294_vm2, %v2558_v25, %v4800_v3  ;;  %v4805_v29 = vld [vmem:[#allocation87_spill] sm:$0xff] }
 0x2b2   : > { %2453 = vmatmul.mubr.msk.f32.gmra.mrb[4].mxu0 %vm1854_vm13, %v1820_v47  ;;  %2476 = vmatprep.mubr.msk.f32.mxu1 %vm1854_vm13, %v1835_v41  ;;  %v1624_v6 = vsel %vm1619_vm7, %v1591_v12, %v4801_v49  ;;  %v4808_v49 = vld [vmem:[#allocation15_spill] sm:$0xff] }
 0x2b3   : > { %v1214_v2 = vpop.permute.xlu0 %1213  ;;  %v1244_v27 = vpop.permute.xlu1 %1243  ;;  %v1657_v10 = vsel %vm1652_vm8, %v1624_v6, %v4802_v45 }
 0x2b4   : > { %v1690_v41 = vsel %vm1685_vm10, %v1657_v10, %v3775_v21  ;;  %v2561_v10 = vld [vmem:[#allocation2 + $0x180] sm:$0xff] }
 0x2b5   : > { %1511 = vrot.lane.b32.xlu0 %v4795_v9, %s2590_s29  ;;  %1447 = vrot.lane.b32.xlu1 %v4796_v63, %s2589_s26  ;;  %v1723_v38 = vsel %vm1718_vm9, %v1690_v41, %v1212_v24  ;;  %v2560_v63 = vld [vmem:[#allocation2 + $0xf0] sm:$0xff]  ;;  %v2562_v41 = vld [vmem:[#allocation2 + $0xf8] sm:$0xff] }
 0x2b7   : > { %v1308_v28 = vpop.permute.xlu0 %1307  ;;  %v1530_v5 = vpop.permute.xlu1 %1529 }
 0x2b8   : > { %v1836_v32 = vsel %vm218_vm1, %v1804_v51, %v1530_v5  ;;  %v1756_v16 = vsel %vm1751_vm11, %v1723_v38, %v1308_v28  ;;  %v1607_v51 = vsel %vm294_vm2, %v2560_v63, %v4805_v29  ;;  %v4809_v38 = vld [vmem:[#allocation90_spill] sm:$0xff] }
 0x2b9   : > { %1227 = vrot.lane.b32.xlu0 %v4795_v9, %s2587_s14  ;;  %1449 = vrot.lane.b32.xlu1 %v4797_v42, %s2589_s26  ;;  %v1592_v9 = vsel %vm294_vm2, %v2559_v56, %v4804_v34  ;;  %v4806_v42 = vld [vmem:[#allocation37_spill] sm:$0xff]  ;;  %v4810_v56 = vld [vmem:[#allocation20_spill] sm:$0xff]  ;;  %v2563_v34 = vld [vmem:[#allocation2 + $0x188] sm:$0xff] }
 0x2ba   : > { %2477 = vmatmul.mubr.msk.f32.gmra.mrb[6].mxu1 %vm1854_vm13, %v1836_v32  ;;  %v1640_v32 = vsel %vm1619_vm7, %v1607_v51, %v3711_v43  ;;  %v802_v29 = vrot.slane %v2563_v34, 2  ;;  %v801_v51 = vrot.slane %v2561_v10, 2 }
 0x2bb   : > { %v1310_v15 = vpop.permute.xlu0 %1309  ;;  %v4148_v11 = vpop.permute.xlu1 %1245 }
 0x2bd   : > { %1513 = vrot.lane.b32.xlu0 %v4798_v23, %s2590_s29  ;;  %1543 = vrot.lane.b32.xlu1 %v4799_v35, %s2590_s29 }
 0x2bf   : > { %v1404_v4 = vpop.permute.xlu0 %1403  ;;  %v1340_v39 = vpop.permute.xlu1 %1339 }
 0x2c0   : > { %v1789_v21 = vsel %vm1784_vm12, %v1756_v16, %v1404_v4 }
 0x2c1   : > { %1229 = vrot.lane.b32.xlu0 %v4798_v23, %s2587_s14  ;;  %1259 = vrot.lane.b32.xlu1 %v4799_v35, %s2587_s14  ;;  %v4807_v35 = vld [vmem:[#allocation58_spill] sm:$0xff] }
 0x2c2   : > { %v1673_v25 = vsel %vm1652_vm8, %v1640_v32, %v4807_v35  ;;  %v4813_v32 = vld [vmem:[#allocation92_spill] sm:$0xff] }
 0x2c3   : > { %v1406_v37 = vpop.permute.xlu0 %1405  ;;  %v1342_v47 = vpop.permute.xlu1 %1341 }
 0x2c5   : > { %1323 = vrot.lane.b32.xlu0 %v3984_v40, %s2588_s21  ;;  %1545 = vrot.lane.b32.xlu1 %v4803_v58, %s2590_s29  ;;  %v1625_v40 = vsel %vm1619_vm7, %v1592_v9, %v3649_v60 }
 0x2c6   : > { %v1658_v23 = vsel %vm1652_vm8, %v1625_v40, %v4806_v42 }
 0x2c7   : > { %v1500_v5 = vpop.permute.xlu0 %1499  ;;  %v1436_v24 = vpop.permute.xlu1 %1435  ;;  %v1691_v43 = vsel %vm1685_vm10, %v1658_v23, %v3793_v18  ;;  %v1608_v18 = vsel %vm294_vm2, %v2562_v41, %v4809_v38  ;;  %v4816_v38 = vld [vmem:[#allocation94_spill] sm:$0xff] }
 0x2c8   : > { %v1821_v28 = vsel %vm218_vm1, %v1789_v21, %v1500_v5  ;;  %v1724_v12 = vsel %vm1718_vm9, %v1691_v43, %v1214_v2  ;;  %v1641_v16 = vsel %vm1619_vm7, %v1608_v18, %v3729_v13 }
 0x2c9   : > { %1325 = vrot.lane.b32.xlu0 %v4020_v46, %s2588_s21  ;;  %2455 = vmatprep.mubr.msk.f32.mxu0 %vm1854_vm13, %v1821_v28  ;;  %v1706_v46 = vsel %vm1685_vm10, %v1673_v25, %v3837_v7  ;;  %v1757_v6 = vsel %vm1751_vm11, %v1724_v12, %v1310_v15  ;;  %v803_v25 = vsel %vm712_vm6, %v801_v51, %v802_v29  ;;  %v4819_v51 = vld [vmem:[#allocation82_spill] sm:$0xff] }
 0x2ca   : > { %1261 = vrot.lane.b32.xlu1 %v4803_v58, %s2587_s14  ;;  %v1739_v4 = vsel %vm1718_vm9, %v1706_v46, %v1244_v27  ;;  %v1790_v7 = vsel %vm1784_vm12, %v1757_v6, %v1406_v37  ;;  %v4811_v37 = vld [vmem:[#allocation57_spill] sm:$0xff]  ;;  %v580_v46 = vld [vmem:[#allocation2 + $0x198] sm:$0xff]  ;;  %v2564_v6 = vld [vmem:[#allocation2 + $0x48] sm:$0xff] }
 0x2cb   : > { %v4191_v60 = vpop.permute.xlu0 %1215  ;;  %v1438_v3 = vpop.permute.xlu1 %1437  ;;  %v1772_v45 = vsel %vm1751_vm11, %v1739_v4, %v1340_v39  ;;  %v1674_v9 = vsel %vm1652_vm8, %v1641_v16, %v4811_v37  ;;  %v809_v4 = vrot.slane %v580_v46, 1 }
 0x2cc   : > { %v1805_v2 = vsel %vm1784_vm12, %v1772_v45, %v1436_v24  ;;  %v1707_v21 = vsel %vm1685_vm10, %v1674_v9, %v3855_v53  ;;  %v4812_v24 = vld [vmem:[#allocation52_spill] sm:$0xff]  ;;  %v4814_v53 = vld [vmem:[#allocation93_spill] sm:$0xff]  ;;  %v582_v9 = vld [vmem:[#allocation2 + $0x1a8] sm:$0x3] }
 0x2cd   : > { %1419 = vrot.lane.b32.xlu0 %v4808_v49, %s2589_s26  ;;  %v1740_v5 = vsel %vm1718_vm9, %v1707_v21, %v4148_v11  ;;  %v804_v43 = vrot.slane %v4814_v53, 2  ;;  %v4815_v45 = vld [vmem:[#allocation76_spill] sm:$0xff] }
 0x2ce   : > { %1355 = vrot.lane.b32.xlu1 %v2561_v10, %s2588_s21  ;;  %v1773_v40 = vsel %vm1751_vm11, %v1740_v5, %v1342_v47  ;;  %v1593_v10 = vsel %vm294_vm2, %v2564_v6, %v4815_v45 }
 0x2cf   : > { %v1502_v58 = vpop.permute.xlu0 %1501  ;;  %v1532_v27 = vpop.permute.xlu1 %1531  ;;  %v1806_v28 = vsel %vm1784_vm12, %v1773_v40, %v1438_v3  ;;  %v4242_v3 = vld [vmem:[#allocation2 + $0x1a0] sm:$0xff]  ;;  %v805_v12 = vsel %vm712_vm6, %v802_v29, %v804_v43  ;;  %v1626_v18 = vsel %vm1619_vm7, %v1593_v10, %v4816_v38  ;;  %v2566_v40 = vld [vmem:[#allocation2 + $0x108] sm:$0xff]  ;;  %v4821_v43 = vld [vmem:[#allocation40_spill] sm:$0xff] }
 0x2d0   : > { %v1822_v15 = vsel %vm218_vm1, %v1790_v7, %v1502_v58  ;;  %v1837_v39 = vsel %vm218_vm1, %v1805_v2, %v1532_v27  ;;  %v810_v49 = vrot.slane %v4242_v3, 1  ;;  %v814_v7 = vrot.slane %v580_v46, 2  ;;  %v4817_v27 = vld [vmem:[#allocation12_spill] sm:$0xff] }
 0x2d1   : > { %1421 = vrot.lane.b32.xlu0 %v4810_v56, %s2589_s26  ;;  %2456 = vmatmul.mubr.msk.f32.gmra.mrb[6].mxu0 %vm1854_vm13, %v1822_v15  ;;  %v815_v58 = vrot.slane %v4242_v3, 2  ;;  %v369_v16 = vadd.f32 1e-08, %v4817_v27  ;;  %v4818_v15 = vld [vmem:[#allocation41_spill] sm:$0xff] }
 0x2d2   : > { %1357 = vrot.lane.b32.xlu1 %v2563_v34, %s2588_s21  ;;  %2479 = vmatprep.mubr.msk.f32.mxu1 %vm1854_vm13, %v1837_v39  ;;  %v811_v2 = vsel %vm631_vm4, %v809_v4, %v810_v49  ;;  %v1659_v39 = vsel %vm1652_vm8, %v1626_v18, %v4818_v15 }
 0x2d3   : > { %v4219_v63 = vpop.permute.xlu0 %1217  ;;  %v4221_v13 = vpop.permute.xlu1 %1247  ;;  %v1692_v37 = vsel %vm1685_vm10, %v1659_v39, %v3783_v36  ;;  %2536 = vrsqrt.f32 %v369_v16 }
 0x2d4   : > { %v1725_v29 = vsel %vm1718_vm9, %v1692_v37, %v4191_v60 }
 0x2d5   : > { %1515 = vrot.lane.b32.xlu0 %v4812_v24, %s2590_s29  ;;  %v816_v24 = vsel %vm712_vm6, %v814_v7, %v815_v58 }
 0x2d6   : > { %1451 = vrot.lane.b32.xlu1 %v4813_v32, %s2589_s26  ;;  %v4820_v32 = vld [vmem:[#allocation17_spill] sm:$0xff] }
 0x2d7   : > { %v1312_v42 = vpop.permute.xlu0 %1311  ;;  %v1534_v23 = vpop.permute.xlu1 %1533  ;;  %v1609_v36 = vsel %vm294_vm2, %v2566_v40, %v4820_v32 }
 0x2d8   : > { %v1838_v35 = vsel %vm218_vm1, %v1806_v28, %v1534_v23  ;;  %v1758_v5 = vsel %vm1751_vm11, %v1725_v29, %v1312_v42  ;;  %v1642_v42 = vsel %vm1619_vm7, %v1609_v36, %v3719_v31  ;;  %v817_v31 = vrot.slane %v582_v9, 2 }
 0x2d9   : > { %1263 = vrot.lane.b32.xlu0 %v803_v25, %s2587_s14  ;;  %2480 = vmatmul.mubr.msk.f32.gmra.mrb[8].mxu1 %vm1854_vm13, %v1838_v35  ;;  %v812_v35 = vrot.slane %v582_v9, 1 }
 0x2da   : > { %1453 = vrot.lane.b32.xlu1 %v3652_v61, %s2589_s26 }
 0x2db   : > { %v1314_v11 = vpop.permute.xlu0 %1313  ;;  %v4240_v47 = vpop.permute.xlu1 %1249  ;;  %v813_v45 = vsel %vm631_vm4, %v810_v49, %v812_v35  ;;  %v2567_v49 = vld [vmem:[#allocation2 + $0x110] sm:$0xff] }
 0x2dd   : > { %1549 = vrot.lane.b32.xlu0 %v805_v12, %s2590_s29  ;;  %v2537_v39 = vpop.eup %2536 }
 0x2de   : > { %1547 = vrot.lane.b32.xlu1 %v803_v25, %s2590_s29 }
 0x2df   : > { %v1408_v61 = vpop.permute.xlu0 %1407  ;;  %v1344_v41 = vpop.permute.xlu1 %1343 }
 0x2e0   : > { %v1791_v28 = vsel %vm1784_vm12, %v1758_v5, %v1408_v61 }
 0x2e1   : > { %1359 = vrot.lane.b32.xlu0 %v580_v46, %s2588_s21 }
 0x2e2   : > { %1517 = vrot.lane.b32.xlu1 %v3397_v44, %s2590_s29  ;;  %v2565_v44 = vld [vmem:[#allocation2 + $0x50] sm:$0xff] }
 0x2e3   : > { %v1410_v56 = vpop.permute.xlu0 %1409  ;;  %v1346_v34 = vpop.permute.xlu1 %1345  ;;  %v1594_v21 = vsel %vm294_vm2, %v2565_v44, %v4819_v51 }
 0x2e4   : > { %v1627_v25 = vsel %vm1619_vm7, %v1594_v21, %v3660_v17 }
 0x2e5   : > { %1455 = vrot.lane.b32.xlu0 %v811_v2, %s2589_s26  ;;  %v1660_v46 = vsel %vm1652_vm8, %v1627_v25, %v4821_v43  ;;  %v4823_v2 = vld [vmem:[#allocation23_spill] sm:$0xff] }
 0x2e6   : > { %1265 = vrot.lane.b32.xlu1 %v805_v12, %s2587_s14  ;;  %v4822_v12 = vld [vmem:[#allocation60_spill] sm:$0xff]  ;;  %v1693_v10 = vsel %vm1685_vm10, %v1660_v46, %v3801_v48  ;;  %v1610_v27 = vsel %vm294_vm2, %v2567_v49, %v4823_v2  ;;  %v4831_v2 = vld [vmem:[#allocation42_spill] sm:$0xff] }
 0x2e7   : > { %v1504_v60 = vpop.permute.xlu0 %1503  ;;  %v1440_v23 = vpop.permute.xlu1 %1439  ;;  %v1675_v4 = vsel %vm1652_vm8, %v1642_v42, %v4822_v12 }
 0x2e8   : > { %v1823_v53 = vsel %vm218_vm1, %v1791_v28, %v1504_v60  ;;  %v1708_v61 = vsel %vm1685_vm10, %v1675_v4, %v3845_v26 }
 0x2e9   : > { %1551 = vrot.lane.b32.xlu0 %v816_v24, %s2590_s29  ;;  %2458 = vmatprep.mubr.msk.f32.mxu0 %vm1854_vm13, %v1823_v53  ;;  %v1741_v38 = vsel %vm1718_vm9, %v1708_v61, %v4221_v13  ;;  %v1643_v13 = vsel %vm1619_vm7, %v1610_v27, %v3737_v50  ;;  %v4825_v50 = vld [vmem:[#allocation3_spill] sm:$0xff]  ;;  %v2570_v61 = vld [vmem:[#allocation2 + $0x120] sm:$0xff] }
 0x2ea   : > { %1361 = vrot.lane.b32.xlu1 %v4242_v3, %s2588_s21  ;;  %v1726_v3 = vsel %vm1718_vm9, %v1693_v10, %v4219_v63  ;;  %v1774_v7 = vsel %vm1751_vm11, %v1741_v38, %v1344_v41  ;;  %v818_v63 = vsel %vm712_vm6, %v815_v58, %v817_v31  ;;  %v4826_v44 = vsub.s32 0, %v4825_v50  ;;  %v4829_v31 = vld [vmem:[#allocation84_spill] sm:$0xff] }
 0x2eb   : > { %v1220_v6 = vpop.permute.xlu0 %1219  ;;  %v1442_v17 = vpop.permute.xlu1 %1441  ;;  %v1759_v18 = vsel %vm1751_vm11, %v1726_v3, %v1314_v11  ;;  %v1807_v26 = vsel %vm1784_vm12, %v1774_v7, %v1440_v23  ;;  %v4827_v23 = vld [vmem:[#allocation79_spill] sm:$0xff] }
 0x2ec   : > { %v1792_v48 = vsel %vm1784_vm12, %v1759_v18, %v1410_v56  ;;  %v4824_v56 = vld [vmem:[#allocation59_spill] sm:$0xff]  ;;  %v2246_v51 = vrot.slane %v2537_v39, %v4826_v44  ;;  %v2571_v39 = vld [vmem:[#allocation2 + $0x128] sm:$0xff] }
 0x2ed   : > { %v1676_v37 = vsel %vm1652_vm8, %v1643_v13, %v4824_v56  ;;  %v4830_v3 = vld [vmem:[#allocation19_spill] sm:$0xff]  ;;  %v4833_v56 = vld [vmem:[#allocation26_spill] sm:$0xff] }
 0x2ee   : > { %1457 = vrot.lane.b32.xlu1 %v813_v45, %s2589_s26  ;;  %v1709_v58 = vsel %vm1685_vm10, %v1676_v37, %v3863_v22  ;;  %v2568_v22 = vld [vmem:[#allocation2 + $0x60] sm:$0xff]  ;;  %v2569_v45 = vld [vmem:[#allocation2 + $0x68] sm:$0xff]  ;;  %v1612_v37 = vsel %vm294_vm2, %v2571_v39, %v4833_v56  ;;  %v4848_v39 = vld [vmem:[#allocation7_spill] sm:$0xff] }
 0x2ef   : > { %v1506_v16 = vpop.permute.xlu0 %1505  ;;  %v1536_v15 = vpop.permute.xlu1 %1535  ;;  %v1742_v21 = vsel %vm1718_vm9, %v1709_v58, %v4240_v47  ;;  %v1595_v35 = vsel %vm294_vm2, %v2568_v22, %v4827_v23  ;;  %v1596_v10 = vsel %vm294_vm2, %v2569_v45, %v4829_v31  ;;  %v4839_v45 = vld [vmem:[#allocation6_spill] sm:$0xff] }
 0x2f0   : > { %v1824_v11 = vsel %vm218_vm1, %v1792_v48, %v1506_v16  ;;  %v1839_v41 = vsel %vm218_vm1, %v1807_v26, %v1536_v15  ;;  %v1775_v5 = vsel %vm1751_vm11, %v1742_v21, %v1346_v34  ;;  %v1628_v47 = vsel %vm1619_vm7, %v1595_v35, %v3647_v62  ;;  %v4828_v34 = vld [vmem:[#allocation43_spill] sm:$0xff]  ;;  %v4832_v48 = vld [vmem:[#allocation62_spill] sm:$0xff] }
 0x2f1   : > { %2459 = vmatmul.mubr.msk.f32.gmra.mrb[8].mxu0 %vm1854_vm13, %v1824_v11  ;;  %2482 = vmatprep.mubr.msk.f32.mxu1 %vm1854_vm13, %v1839_v41  ;;  %v1808_v24 = vsel %vm1784_vm12, %v1775_v5, %v1442_v17  ;;  %v1661_v53 = vsel %vm1652_vm8, %v1628_v47, %v4828_v34  ;;  %v1611_v62 = vsel %vm294_vm2, %v2570_v61, %v4830_v3  ;;  %v4836_v47 = vld [vmem:[#allocation111_spill] sm:$0xff]  ;;  %v4840_v3 = vld [vmem:[#allocation10_spill] sm:$0xff] }
 0x2f2   : > { %1553 = vrot.lane.b32.xlu1 %v818_v63, %s2590_s29  ;;  %v1694_v12 = vsel %vm1685_vm10, %v1661_v53, %v3791_v52  ;;  %v1629_v49 = vsel %vm1619_vm7, %v1596_v10, %v3674_v1  ;;  %v1644_v52 = vsel %vm1619_vm7, %v1611_v62, %v3727_v30  ;;  %v1598_v62 = vsel %vm294_vm2, %v3910_v33, %v4840_v3 }
 0x2f3   : > { %v1222_v9 = vpop.permute.xlu0 %1221  ;;  %v1252_v29 = vpop.permute.xlu1 %1251  ;;  %v1727_v4 = vsel %vm1718_vm9, %v1694_v12, %v1220_v6  ;;  %v1662_v27 = vsel %vm1652_vm8, %v1629_v49, %v4831_v2  ;;  %v1677_v26 = vsel %vm1652_vm8, %v1644_v52, %v4832_v48  ;;  %v4843_v2 = vld [vmem:[#allocation97_spill] sm:$0xff] }
 0x2f4   : > { %v1695_v63 = vsel %vm1685_vm10, %v1662_v27, %v3809_v14  ;;  %v1710_v1 = vsel %vm1685_vm10, %v1677_v26, %v3853_v55  ;;  %v1645_v55 = vsel %vm1619_vm7, %v1612_v37, %v3745_v8  ;;  %v1631_v27 = vsel %vm1619_vm7, %v1598_v62, %v4843_v2  ;;  %v4844_v48 = vld [vmem:[#allocation5_spill] sm:$0xff]  ;;  %v4859_v2 = vld [vmem:[#allocation91_spill] sm:$0xff] }
 0x2f5   : > { %v1728_v30 = vsel %vm1718_vm9, %v1695_v63, %v1222_v9  ;;  %v1743_v13 = vsel %vm1718_vm9, %v1710_v1, %v1252_v29  ;;  %v4846_v63 = vld [vmem:[#allocation64_spill] sm:$0xff] }
 0x2f6   : > { %2248 = vbcast.lane.b32.xlu1 %v2246_v51, 256  ;;  %v4834_v51 = vld [vmem:[#allocation61_spill] sm:$0xff] }
 0x2f7   : > { %v1316_v40 = vpop.permute.xlu0 %1315  ;;  %v1538_v32 = vpop.permute.xlu1 %1537  ;;  %v1678_v21 = vsel %vm1652_vm8, %v1645_v55, %v4834_v51  ;;  %v4850_v55 = vld [vmem:[#allocation113_spill] sm:$0xff] }
 0x2f8   : > { %v1840_v36 = vsel %vm218_vm1, %v1808_v24, %v1538_v32  ;;  %v1760_v17 = vsel %vm1751_vm11, %v1727_v4, %v1316_v40  ;;  %v1711_v40 = vsel %vm1685_vm10, %v1678_v21, %v3871_v20 }
 0x2f9   : > { %2483 = vmatmul.mubr.msk.f32.gmra.mrb[10].mxu1 %vm1854_vm13, %v1840_v36 }
 0x2fb   : > { %v1318_v28 = vpop.permute.xlu0 %1317  ;;  %v1254_v60 = vpop.permute.xlu1 %1253 }
 0x2fc   : > { %v1761_v11 = vsel %vm1751_vm11, %v1728_v30, %v1318_v28  ;;  %v1744_v32 = vsel %vm1718_vm9, %v1711_v40, %v1254_v60 }
 0x2ff   : > { %v1412_v25 = vpop.permute.xlu0 %1411  ;;  %v1348_v42 = vpop.permute.xlu1 %1347 }
 0x300   : > { %v1793_v38 = vsel %vm1784_vm12, %v1760_v17, %v1412_v25  ;;  %v1776_v41 = vsel %vm1751_vm11, %v1743_v13, %v1348_v42  ;;  %v4835_v42 = vld [vmem:[#allocation81_spill] sm:$0xff] }
 0x301   : > { %v1597_v34 = vsel %vm294_vm2, %v4836_v47, %v4835_v42 }
 0x303   : > { %v1414_v43 = vpop.permute.xlu0 %1413  ;;  %v1350_v46 = vpop.permute.xlu1 %1349 }
 0x304   : > { %v1794_v58 = vsel %vm1784_vm12, %v1761_v11, %v1414_v43  ;;  %v1777_v8 = vsel %vm1751_vm11, %v1744_v32, %v1350_v46  ;;  %v4837_v43 = vld [vmem:[#allocation95_spill] sm:$0xff]  ;;  %v4838_v46 = vld [vmem:[#allocation45_spill] sm:$0xff]  ;;  %v4847_v11 = vld [vmem:[#allocation104_spill] sm:$0xff] }
 0x305   : > { %v1630_v60 = vsel %vm1619_vm7, %v1597_v34, %v4837_v43  ;;  %v4851_v32 = vld [vmem:[#allocation100_spill] sm:$0xff] }
 0x306   : > { %v1663_v12 = vsel %vm1652_vm8, %v1630_v60, %v4838_v46 }
 0x307   : > { %v1508_v18 = vpop.permute.xlu0 %1507  ;;  %v1444_v7 = vpop.permute.xlu1 %1443  ;;  %v1696_v31 = vsel %vm1685_vm10, %v1663_v12, %v4839_v45  ;;  %v4855_v45 = vld [vmem:[#allocation65_spill] sm:$0xff] }
 0x308   : > { %v1825_v6 = vsel %vm218_vm1, %v1793_v38, %v1508_v18  ;;  %v1809_v50 = vsel %vm1784_vm12, %v1776_v41, %v1444_v7  ;;  %v4841_v38 = vld [vmem:[#allocation22_spill] sm:$0xff]  ;;  %v4842_v18 = vld [vmem:[#allocation112_spill] sm:$0xff] }
 0x309   : > { %2461 = vmatprep.mubr.msk.f32.mxu0 %vm1854_vm13, %v1825_v6  ;;  %v1613_v7 = vsel %vm294_vm2, %v4842_v18, %v4841_v38  ;;  %v4858_v18 = vld [vmem:[#allocation103_spill] sm:$0xff] }
 0x30a   : > { %v1646_v26 = vsel %vm1619_vm7, %v1613_v7, %v4844_v48 }
 0x30b   : > { %v1224_v16 = vpop.permute.xlu0 %1223  ;;  %v1446_v15 = vpop.permute.xlu1 %1445  ;;  %v1679_v1 = vsel %vm1652_vm8, %v1646_v26, %v4846_v63 }
 0x30c   : > { %v1810_v36 = vsel %vm1784_vm12, %v1777_v8, %v1446_v15  ;;  %v1729_v10 = vsel %vm1718_vm9, %v1696_v31, %v1224_v16  ;;  %v4845_v15 = vld [vmem:[#allocation44_spill] sm:$0xff]  ;;  %v1712_v56 = vsel %vm1685_vm10, %v1679_v1, %v4848_v39 }
 0x30d   : > { %v1664_v33 = vsel %vm1652_vm8, %v1631_v27, %v4845_v15  ;;  %v1616_v27 = vsel %vm294_vm2, %v4033_v19, %v4859_v2 }
 0x30e   : > { %v1697_v41 = vsel %vm1685_vm10, %v1664_v33, %v4847_v11  ;;  %v4861_v33 = vld [vmem:[#allocation101_spill] sm:$0xff] }
 0x30f   : > { %v1510_v14 = vpop.permute.xlu0 %1509  ;;  %v1540_v44 = vpop.permute.xlu1 %1539  ;;  %v1649_v63 = vsel %vm1619_vm7, %v1616_v27, %v4861_v33 }
 0x310   : > { %v1826_v9 = vsel %vm218_vm1, %v1794_v58, %v1510_v14  ;;  %v1841_v29 = vsel %vm218_vm1, %v1809_v50, %v1540_v44  ;;  %v4849_v44 = vld [vmem:[#allocation28_spill] sm:$0xff] }
 0x311   : > { %2462 = vmatmul.mubr.msk.f32.gmra.mrb[10].mxu0 %vm1854_vm13, %v1826_v9  ;;  %2485 = vmatprep.mubr.msk.f32.mxu1 %vm1854_vm13, %v1841_v29  ;;  %v1614_v9 = vsel %vm294_vm2, %v4850_v55, %v4849_v44  ;;  %v4867_v55 = vld [vmem:[#allocation98_spill] sm:$0xff] }
 0x312   : > { %v1647_v8 = vsel %vm1619_vm7, %v1614_v9, %v4851_v32 }
 0x313   : > { %v1226_v5 = vpop.permute.xlu0 %1225  ;;  %v1256_v24 = vpop.permute.xlu1 %1255 }
 0x314   : > { %v1730_v37 = vsel %vm1718_vm9, %v1697_v41, %v1226_v5  ;;  %v1745_v58 = vsel %vm1718_vm9, %v1712_v56, %v1256_v24  ;;  %v4863_v41 = vld [vmem:[#allocation66_spill] sm:$0xff] }
 0x315   : > { %v1682_v19 = vsel %vm1652_vm8, %v1649_v63, %v4863_v41  ;;  %v4864_v56 = vld [vmem:[#allocation86_spill] sm:$0xff] }
 0x317   : > { %v1320_v28 = vpop.permute.xlu0 %1319  ;;  %v1542_v22 = vpop.permute.xlu1 %1541 }
 0x318   : > { %v1842_v23 = vsel %vm218_vm1, %v1810_v36, %v1542_v22  ;;  %v1762_v61 = vsel %vm1751_vm11, %v1729_v10, %v1320_v28  ;;  %v4852_v36 = vld [vmem:[#allocation63_spill] sm:$0xff] }
 0x319   : > { %2486 = vmatmul.mubr.msk.f32.gmra.mrb[12].mxu1 %vm1854_vm13, %v1842_v23  ;;  %v1680_v28 = vsel %vm1652_vm8, %v1647_v8, %v4852_v36 }
 0x31b   : > { %v1322_v35 = vpop.permute.xlu0 %1321  ;;  %v1258_v25 = vpop.permute.xlu1 %1257 }
 0x31c   : > { %v1763_v50 = vsel %vm1751_vm11, %v1730_v37, %v1322_v35  ;;  %v4853_v35 = vld [vmem:[#allocation108_spill] sm:$0xff]  ;;  %v1600_v37 = vsel %vm294_vm2, %v3993_v54, %v4864_v56 }
 0x31d   : > { %v1713_v42 = vsel %vm1685_vm10, %v1680_v28, %v4853_v35  ;;  %v1633_v9 = vsel %vm1619_vm7, %v1600_v37, %v4867_v55  ;;  %v4869_v28 = vld [vmem:[#allocation46_spill] sm:$0xff] }
 0x31e   : > { %v1746_v47 = vsel %vm1718_vm9, %v1713_v42, %v1258_v25  ;;  %v1666_v35 = vsel %vm1652_vm8, %v1633_v9, %v4869_v28 }
 0x31f   : > { %v1416_v53 = vpop.permute.xlu0 %1415  ;;  %v1352_v20 = vpop.permute.xlu1 %1351 }
 0x320   : > { %v1795_v49 = vsel %vm1784_vm12, %v1762_v61, %v1416_v53  ;;  %v1778_v14 = vsel %vm1751_vm11, %v1745_v58, %v1352_v20  ;;  %v4856_v61 = vld [vmem:[#allocation96_spill] sm:$0xff] }
 0x323   : > { %v1418_v4 = vpop.permute.xlu0 %1417  ;;  %v1354_v17 = vpop.permute.xlu1 %1353 }
 0x324   : > { %v1796_v29 = vsel %vm1784_vm12, %v1763_v50, %v1418_v4  ;;  %v1779_v34 = vsel %vm1751_vm11, %v1746_v47, %v1354_v17  ;;  %v4854_v4 = vld [vmem:[#allocation83_spill] sm:$0xff]  ;;  %v4866_v50 = vld [vmem:[#allocation109_spill] sm:$0xff] }
 0x325   : > { %v1599_v31 = vsel %vm294_vm2, %v4855_v45, %v4854_v4  ;;  %v4857_v17 = vld [vmem:[#allocation47_spill] sm:$0xff] }
 0x326   : > { %v1632_v25 = vsel %vm1619_vm7, %v1599_v31, %v4856_v61  ;;  %v4872_v31 = vld [vmem:[#allocation99_spill] sm:$0xff] }
 0x327   : > { %v1512_v52 = vpop.permute.xlu0 %1511  ;;  %v1448_v6 = vpop.permute.xlu1 %1447  ;;  %v1665_v62 = vsel %vm1652_vm8, %v1632_v25, %v4857_v17 }
 0x328   : > { %v1827_v16 = vsel %vm218_vm1, %v1795_v49, %v1512_v52  ;;  %v1811_v51 = vsel %vm1784_vm12, %v1778_v14, %v1448_v6  ;;  %v1698_v7 = vsel %vm1685_vm10, %v1665_v62, %v4858_v18  ;;  %v1715_v14 = vsel %vm1685_vm10, %v1682_v19, %v4866_v50 }
 0x329   : > { %2464 = vmatprep.mubr.msk.f32.mxu0 %vm1854_vm13, %v1827_v16  ;;  %v4860_v16 = vld [vmem:[#allocation25_spill] sm:$0xff] }
 0x32a   : > { %v1615_v15 = vsel %vm294_vm2, %v4014_v57, %v4860_v16  ;;  %v4865_v57 = vld [vmem:[#allocation67_spill] sm:$0xff] }
 0x32b   : > { %v1228_v30 = vpop.permute.xlu0 %1227  ;;  %v1450_v13 = vpop.permute.xlu1 %1449 }
 0x32c   : > { %v1812_v53 = vsel %vm1784_vm12, %v1779_v34, %v1450_v13  ;;  %v1731_v52 = vsel %vm1718_vm9, %v1698_v7, %v1228_v30  ;;  %v4862_v30 = vld [vmem:[#allocation4_spill] sm:$0xff] }
 0x32d   : > { %v1648_v11 = vsel %vm1619_vm7, %v1615_v15, %v4862_v30  ;;  %v4877_v15 = vld [vmem:[#allocation69_spill] sm:$0xff] }
 0x32e   : > { %v1681_v58 = vsel %vm1652_vm8, %v1648_v11, %v4865_v57 }
 0x32f   : > { %v1514_v21 = vpop.permute.xlu0 %1513  ;;  %v1544_v40 = vpop.permute.xlu1 %1543 }
 0x330   : > { %v1828_v5 = vsel %vm218_vm1, %v1796_v29, %v1514_v21  ;;  %v1843_v24 = vsel %vm218_vm1, %v1811_v51, %v1544_v40  ;;  %v4868_v29 = vld [vmem:[#allocation106_spill] sm:$0xff] }
 0x331   : > { %2465 = vmatmul.mubr.msk.f32.gmra.mrb[12].mxu0 %vm1854_vm13, %v1828_v5  ;;  %2488 = vmatprep.mubr.msk.f32.mxu1 %vm1854_vm13, %v1843_v24  ;;  %v1714_v51 = vsel %vm1685_vm10, %v1681_v58, %v4868_v29 }
 0x333   : > { %v1230_v22 = vpop.permute.xlu0 %1229  ;;  %v1260_v23 = vpop.permute.xlu1 %1259 }
 0x334   : > { %v1747_v32 = vsel %vm1718_vm9, %v1714_v51, %v1260_v23 }
 0x337   : > { %v1324_v20 = vpop.permute.xlu0 %1323  ;;  %v1546_v43 = vpop.permute.xlu1 %1545 }
 0x338   : > { %v1844_v60 = vsel %vm218_vm1, %v1812_v53, %v1546_v43  ;;  %v1764_v6 = vsel %vm1751_vm11, %v1731_v52, %v1324_v20  ;;  %v4870_v53 = vld [vmem:[#allocation105_spill] sm:$0xff] }
 0x339   : > { %2489 = vmatmul.mubr.msk.f32.gmra.mrb[14].mxu1 %vm1854_vm13, %v1844_v60  ;;  %v1699_v23 = vsel %vm1685_vm10, %v1666_v35, %v4870_v53  ;;  %v4871_v60 = vld [vmem:[#allocation27_spill] sm:$0xff] }
 0x33a   : > { %v1732_v43 = vsel %vm1718_vm9, %v1699_v23, %v1230_v22  ;;  %v4873_v22 = vld [vmem:[#allocation70_spill] sm:$0xff] }
 0x33b   : > { %v1326_v46 = vpop.permute.xlu0 %1325 }
 0x33c   : > { %v1262_v12 = vpop.permute.xlu1 %1261  ;;  %v1765_v4 = vsel %vm1751_vm11, %v1732_v43, %v1326_v46 }
 0x33d   : > { %v1748_v21 = vsel %vm1718_vm9, %v1715_v14, %v1262_v12  ;;  %v1617_v12 = vsel %vm294_vm2, %v4108_v59, %v4871_v60  ;;  %v4874_v59 = vld [vmem:[#allocation107_spill] sm:$0xff] }
 0x33f   : > { %v1420_v10 = vpop.permute.xlu0 %1419 }
 0x340   : > { %v1356_v3 = vpop.permute.xlu1 %1355  ;;  %v1797_v48 = vsel %vm1784_vm12, %v1764_v6, %v1420_v10  ;;  %v1650_v10 = vsel %vm1619_vm7, %v1617_v12, %v4872_v31  ;;  %v4875_v6 = vld [vmem:[#allocation9_spill] sm:$0xff] }
 0x341   : > { %v1780_v5 = vsel %vm1751_vm11, %v1747_v32, %v1356_v3  ;;  %v1683_v17 = vsel %vm1652_vm8, %v1650_v10, %v4873_v22  ;;  %v1618_v2 = vsel %vm294_vm2, %v4124_v0, %v4875_v6  ;;  %v2252_v31 = vld [vmem:[%s4536_s3] sm:$0xff]  ;;  %v2253_v22 = vld [vmem:[%s4536_s3 + $0x8] sm:$0xff] }
 0x342   : > { %v1716_v46 = vsel %vm1685_vm10, %v1683_v17, %v4874_v59 }
 0x343   : > { %v1422_v38 = vpop.permute.xlu0 %1421 }
 0x344   : > { %v1358_v49 = vpop.permute.xlu1 %1357  ;;  %v1798_v61 = vsel %vm1784_vm12, %v1765_v4, %v1422_v38 }
 0x345   : > { %v1781_v54 = vsel %vm1751_vm11, %v1748_v21, %v1358_v49 }
 0x347   : > { %v1516_v26 = vpop.permute.xlu0 %1515 }
 0x348   : > { %v1829_v1 = vsel %vm218_vm1, %v1797_v48, %v1516_v26  ;;  %v1452_v13 = vpop.permute.xlu1 %1451  ;;  %v4876_v26 = vld [vmem:[#allocation102_spill] sm:$0xff] }
 0x349   : > { %2467 = vmatprep.mubr.msk.f32.mxu0 %vm1854_vm13, %v1829_v1  ;;  %v1813_v42 = vsel %vm1784_vm12, %v1780_v5, %v1452_v13  ;;  %v1651_v16 = vsel %vm1619_vm7, %v1618_v2, %v4876_v26  ;;  %v4878_v1 = vld [vmem:[#allocation110_spill] sm:$0xff] }
 0x34a   : > { %v1684_v33 = vsel %vm1652_vm8, %v1651_v16, %v4877_v15 }
 0x34b   : > { %v1264_v39 = vpop.permute.xlu0 %1263  ;;  %v1717_v13 = vsel %vm1685_vm10, %v1684_v33, %v4878_v1 }
 0x34c   : > { %v1454_v44 = vpop.permute.xlu1 %1453  ;;  %v1749_v7 = vsel %vm1718_vm9, %v1716_v46, %v1264_v39 }
 0x34d   : > { %v4468_v40 = vpop.f32.mrb[2].mxu1  ;;  %v1814_v24 = vsel %vm1784_vm12, %v1781_v54, %v1454_v44 }
 0x34e   : > { %v4472_v8 = vpop.f32.mrb[3].mxu1 }
 0x34f   : > { %v1550_v36 = vpop.permute.xlu0 %1549 }
 0x350   : > { %v1846_v47 = vsel %vm218_vm1, %v1814_v24, %v1550_v36  ;;  %v1548_v34 = vpop.permute.xlu1 %1547 }
 0x351   : > { %v1845_v20 = vsel %vm218_vm1, %v1813_v42, %v1548_v34 }
 0x352   : > { %2491 = vmatprep.mubr.msk.f32.mxu1 %vm1854_vm13, %v1845_v20 }
 0x353   : > { %2492 = vmatmul.mubr.msk.f32.gmra.mrb[16].mxu1 %vm1854_vm13, %v1846_v47  ;;  %v1360_v45 = vpop.permute.xlu0 %1359 }
 0x354   : > { %v1518_v25 = vpop.permute.xlu1 %1517  ;;  %v1782_v49 = vsel %vm1751_vm11, %v1749_v7, %v1360_v45 }
 0x355   : > { %v1830_v3 = vsel %vm218_vm1, %v1798_v61, %v1518_v25 }
 0x356   : > { %2468 = vmatmul.mubr.msk.f32.gmra.mrb[14].mxu0 %vm1854_vm13, %v1830_v3 }
 0x357   : > { %v1456_v62 = vpop.permute.xlu0 %1455 }
 0x358   : > { %v1266_v18 = vpop.permute.xlu1 %1265  ;;  %v1815_v52 = vsel %vm1784_vm12, %v1782_v49, %v1456_v62 }
 0x359   : > { %v1750_v30 = vsel %vm1718_vm9, %v1717_v13, %v1266_v18 }
 0x35b   : > { %v1552_v38 = vpop.permute.xlu0 %1551 }
 0x35c   : > { %v1847_v27 = vsel %vm218_vm1, %v1815_v52, %v1552_v38  ;;  %v1362_v48 = vpop.permute.xlu1 %1361 }
 0x35d   : > { %2494 = vmatprep.mubr.msk.f32.mxu1 %vm1854_vm13, %v1847_v27  ;;  %v1783_v11 = vsel %vm1751_vm11, %v1750_v30, %v1362_v48 }
 0x360   : > { %v1458_v63 = vpop.permute.xlu1 %1457 }
 0x361   : > { %v1816_v0 = vsel %vm1784_vm12, %v1783_v11, %v1458_v63 }
 0x364   : > { %v1554_v41 = vpop.permute.xlu1 %1553 }
 0x365   : > { %v1848_v19 = vsel %vm218_vm1, %v1816_v0, %v1554_v41  ;;  %v2451_v39 = vpop.f32.mrb[2].mxu0 }
 0x366   : > { %v2020_v56 = vpop.f32.mrb[3].mxu0  ;;  %2495 = vmatmul.mubr.msk.f32.gmra.mrb[18].mxu1 %vm1854_vm13, %v1848_v19 }
 0x367   : > { %2179 = vxpose.xlu0.b32.start [1/16] (narrow) %v2020_v56, 8 }
 0x368   : > { %v2249_v45 = vpop.permute.xlu1 %2248 }
 0x36b   : > { %2180 = vxpose.xlu0.b32.cont [2/16] (narrow) %v2451_v39, 8 }
 0x36d   : > { %v2475_v37 = vpop.f32.mrb[4].mxu1 }
 0x36e   : > { %v2100_v57 = vpop.f32.mrb[5].mxu1 }
 0x36f   : > { %2211 = vxpose.xlu1.b32.start [1/16] (narrow) %v2100_v57, 8 }
 0x373   : > { %2212 = vxpose.xlu1.b32.cont [2/16] (narrow) %v2475_v37, 8 }
 0x385   : > { %v2454_v58 = vpop.f32.mrb[4].mxu0 }
 0x386   : > { %v2030_v50 = vpop.f32.mrb[5].mxu0 }
 0x387   : > { %2181 = vxpose.xlu0.b32.cont [3/16] (narrow) %v2030_v50, 8 }
 0x38b   : > { %2182 = vxpose.xlu0.b32.cont [4/16] (narrow) %v2454_v58, 8 }
 0x38d   : > { %v2478_v14 = vpop.f32.mrb[6].mxu1 }
 0x38e   : > { %v2110_v44 = vpop.f32.mrb[7].mxu1 }
 0x38f   : > { %2213 = vxpose.xlu1.b32.cont [3/16] (narrow) %v2110_v44, 8 }
 0x393   : > { %2214 = vxpose.xlu1.b32.cont [4/16] (narrow) %v2478_v14, 8 }
 0x3a4   : > { %v2457_v55 = vpop.f32.mrb[6].mxu0 }
 0x3a5   : > { %v2040_v9 = vpop.f32.mrb[7].mxu0 }
 0x3a6   : > { %2183 = vxpose.xlu0.b32.cont [5/16] (narrow) %v2040_v9, 8 }
 0x3aa   : > { %2184 = vxpose.xlu0.b32.cont [6/16] (narrow) %v2457_v55, 8 }
 0x3ac   : > { %v2481_v29 = vpop.f32.mrb[8].mxu1 }
 0x3ad   : > { %v2120_v51 = vpop.f32.mrb[9].mxu1 }
 0x3ae   : > { %2215 = vxpose.xlu1.b32.cont [5/16] (narrow) %v2120_v51, 8 }
 0x3b2   : > { %2216 = vxpose.xlu1.b32.cont [6/16] (narrow) %v2481_v29, 8 }
 0x3c4   : > { %v2460_v21 = vpop.f32.mrb[8].mxu0 }
 0x3c5   : > { %v2050_v32 = vpop.f32.mrb[9].mxu0 }
 0x3c6   : > { %2185 = vxpose.xlu0.b32.cont [7/16] (narrow) %v2050_v32, 8 }
 0x3ca   : > { %2186 = vxpose.xlu0.b32.cont [8/16] (narrow) %v2460_v21, 8 }
 0x3cc   : > { %v2484_v54 = vpop.f32.mrb[10].mxu1 }
 0x3cd   : > { %v2130_v5 = vpop.f32.mrb[11].mxu1 }
 0x3ce   : > { %2217 = vxpose.xlu1.b32.cont [7/16] (narrow) %v2130_v5, 8 }
 0x3d2   : > { %2218 = vxpose.xlu1.b32.cont [8/16] (narrow) %v2484_v54, 8 }
 0x3e4   : > { %v2463_v24 = vpop.f32.mrb[10].mxu0 }
 0x3e5   : > { %v2060_v36 = vpop.f32.mrb[11].mxu0 }
 0x3e6   : > { %2187 = vxpose.xlu0.b32.cont [9/16] (narrow) %v2060_v36, 8 }
 0x3ea   : > { %2188 = vxpose.xlu0.b32.cont [10/16] (narrow) %v2463_v24, 8 }
 0x3ec   : > { %v2487_v28 = vpop.f32.mrb[12].mxu1 }
 0x3ed   : > { %v2140_v35 = vpop.f32.mrb[13].mxu1 }
 0x3ee   : > { %2219 = vxpose.xlu1.b32.cont [9/16] (narrow) %v2140_v35, 8 }
 0x3f2   : > { %2220 = vxpose.xlu1.b32.cont [10/16] (narrow) %v2487_v28, 8 }
 0x404   : > { %v2466_v42 = vpop.f32.mrb[12].mxu0 }
 0x405   : > { %v2070_v47 = vpop.f32.mrb[13].mxu0 }
 0x406   : > { %2189 = vxpose.xlu0.b32.cont [11/16] (narrow) %v2070_v47, 8 }
 0x40a   : > { %2190 = vxpose.xlu0.b32.cont [12/16] (narrow) %v2466_v42, 8 }
 0x40c   : > { %v2490_v34 = vpop.f32.mrb[14].mxu1 }
 0x40d   : > { %v2150_v53 = vpop.f32.mrb[15].mxu1 }
 0x40e   : > { %2221 = vxpose.xlu1.b32.cont [11/16] (narrow) %v2150_v53, 8 }
 0x412   : > { %2222 = vxpose.xlu1.b32.cont [12/16] (narrow) %v2490_v34, 8 }
 0x426   : > { %v2493_v23 = vpop.f32.mrb[16].mxu1 }
 0x427   : > { %v2160_v20 = vpop.f32.mrb[17].mxu1 }
 0x428   : > { %2223 = vxpose.xlu1.b32.cont [13/16] (narrow) %v2160_v20, 8 }
 0x429   : > { %v2469_v43 = vpop.f32.mrb[14].mxu0 }
 0x42a   : > { %v2080_v60 = vpop.f32.mrb[15].mxu0 }
 0x42b   : > { %2191 = vxpose.xlu0.b32.cont [13/16] (narrow) %v2080_v60, 8 }
 0x42c   : > { %2224 = vxpose.xlu1.b32.cont [14/16] (narrow) %v2493_v23, 8 }
 0x42f   : > { %2192 = vxpose.xlu0.b32.cont [14/16] (narrow) %v2469_v43, 8 }
 0x433   : > { %2193 = vxpose.xlu0.b32.cont [15/16] (narrow) %v4472_v8, 8 }
 0x437   : > { %2194 = vxpose.xlu0.b32.end [16/16] (narrow) %v4468_v40, 8 }
 0x439   : > { %v2496_v12 = vpop.f32.mrb[18].mxu1 }
 0x43a   : > { %v2170_v4 = vpop.f32.mrb[19].mxu1 }
 0x43b   : > { %2225 = vxpose.xlu1.b32.cont [15/16] (narrow) %v2170_v4, 8 }
 0x43f   : > { %2226 = vxpose.xlu1.b32.end [16/16] (narrow) %v2496_v12, 8 }
 0x47b   : > { %v2195_v10 = vpop.trf.xlu0 }
 0x47c   : > { %v2250_v61 = vmul.f32 %v2249_v45, %v2195_v10 }
 0x47e   : > { %v2254_v25 = vadd.f32 %v2252_v31, %v2250_v61 }
 0x480   : > { %vm2256_vm14 = vcmp.ge.f32.partialorder %v2254_v25, 0.0  ;;  %v2258_v3 = vmul.f32 0.2, %v2254_v25 }
 0x482   : > { %v2260_v40 = vsel %vm2256_vm14, %v2254_v25, %v2258_v3 }
 0x483   : > { %v2262_v8 = vmul.f32 1.4142135, %v2260_v40  ;;  %v2227_v17 = vpop.trf.xlu1 }
 0x484   : > { %v2251_v62 = vmul.f32 %v2249_v45, %v2227_v17 }
 0x485   : > { %2264 = vst [vmem:[%s211_s9] sm:$0xff] %v2262_v8 }
 0x486   : > { %v2255_v59 = vadd.f32 %v2253_v22, %v2251_v62 }
 0x488   : > { %vm2257_vm15 = vcmp.ge.f32.partialorder %v2255_v59, 0.0  ;;  %v2259_v46 = vmul.f32 0.2, %v2255_v59 }
 0x48a   : > { %v2261_v18 = vsel %vm2257_vm15, %v2255_v59, %v2259_v46 }
 0x48b   : > { %v2263_v7 = vmul.f32 1.4142135, %v2261_v18 }
 0x48d   : > { %2265 = vst [vmem:[%s211_s9 + $0x8] sm:$0xff] %v2263_v7 }
 0x48e PF: > { %s14_s15 = sadd.s32 1, %s2578_s15  }
 0x48f   : > { %p11_p4 = scmp.ge.s32.totalorder %s14_s15, 4  }
 0x491   :  { %13 = sbr.rel (!%p11_p4) target bundleno = 1 (0x1), region = 70 }

</bundles_post_ra>
